<compile_context>
chip_gen: v7x
topology: tpu7x:2x2x1
jax: 0.10.0
libtpu: 0.0.40
codegen_flags: <defaults>
</compile_context>

<pallas_src>
import functools
import math

import jax
import jax.numpy as jnp
from jax.experimental import pallas as pl
from jax.experimental.pallas import tpu as pltpu


NEG_INF = -1e20                       # matches torch masked_fill(-1e20)
_VMEM_LIMIT = 32 * 1024 * 1024        # fits v5e/v6e/v7x scoped-VMEM budgets


# ---------------------------------------------------------------------------
# helpers
# ---------------------------------------------------------------------------
def _round_up(x: int, m: int) -> int:
    return ((x + m - 1) // m) * m


def _tile(dim: int, prefer: int, unit: int) -> int:
    """Largest multiple of `unit` that divides `dim` and is <= prefer.
    Falls back to the full dim (always legal) when dim is not a multiple."""
    if dim % unit != 0:
        return dim
    best = unit
    t = unit
    cap = min(prefer, dim)
    while t <= cap:
        if dim % t == 0:
            best = t
        t += unit
    return best


def _pad_seq(x, s_p, axis=1):
    s = x.shape[axis]
    if s == s_p:
        return x
    pad = [(0, 0)] * x.ndim
    pad[axis] = (0, s_p - s)
    return jnp.pad(x, pad)


def _split_heads(x, h, d_k):
    b, s, _ = x.shape
    return x.reshape(b, s, h, d_k).transpose(0, 2, 1, 3)


# ---------------------------------------------------------------------------
# Linear:  y = x @ W^T + b   (torch nn.Linear semantics, weight pre-transposed)
# ---------------------------------------------------------------------------
def _linear_kernel(x_ref, w_ref, b_ref, o_ref, acc_ref):
    kk = pl.program_id(2)

    @pl.when(kk == 0)
    def _():
        acc_ref[...] = jnp.zeros_like(acc_ref)

    acc_ref[...] += jnp.dot(x_ref[...], w_ref[...],
                            preferred_element_type=jnp.float32)

    @pl.when(kk == pl.num_programs(2) - 1)
    def _():
        o_ref[...] = (acc_ref[...] + b_ref[...]).astype(o_ref.dtype)


def linear(x2d, wt, b, *, out_dtype=jnp.float32,
           tm_pref=512, tn_pref=256, tk_pref=512):
    """x2d: (rows, d_in); wt: (d_in, d_out) pre-transposed bf16; b: (d_out,)."""
    rows, d_in = x2d.shape
    d_out = wt.shape[1]

    x = x2d.astype(jnp.bfloat16)                 # bf16 MXU operands, f32 accum
    rows_p = _round_up(rows, 16)                 # bf16 sublane tile is 16
    if rows_p != rows:
        x = jnp.pad(x, ((0, rows_p - rows), (0, 0)))

    tm = _tile(rows_p, tm_pref, 16)
    tn = _tile(d_out, tn_pref, 128)
    tk = _tile(d_in, tk_pref, 128)
    # v7x has 2 TensorCores: keep >= 2 steps on a parallel grid axis if we can.
    if rows_p // tm < 2 and d_out // tn < 2 and tn % 256 == 0:
        tn //= 2

    b2 = b.reshape(1, d_out).astype(jnp.float32)

    out = pl.pallas_call(
        _linear_kernel,
        out_shape=jax.ShapeDtypeStruct((rows_p, d_out), out_dtype),
        grid_spec=pltpu.PrefetchScalarGridSpec(
            num_scalar_prefetch=0,
            grid=(rows_p // tm, d_out // tn, d_in // tk),
            in_specs=[
                pl.BlockSpec((tm, tk), lambda i, j, k: (i, k)),
                pl.BlockSpec((tk, tn), lambda i, j, k: (k, j)),
                pl.BlockSpec((1, tn), lambda i, j, k: (0, j)),
            ],
            out_specs=pl.BlockSpec((tm, tn), lambda i, j, k: (i, j)),
            scratch_shapes=[pltpu.VMEM((tm, tn), jnp.float32)],
        ),
        compiler_params=pltpu.CompilerParams(
            dimension_semantics=("parallel", "parallel", "arbitrary"),
            vmem_limit_bytes=_VMEM_LIMIT),
    )(x, wt.astype(jnp.bfloat16), b2)
    return out[:rows] if rows_p != rows else out


# ---------------------------------------------------------------------------
# Flash attention (online softmax, additive mask bias, dead-block skipping)
# ---------------------------------------------------------------------------
def _flash_kernel(blk_ref, *refs, has_bias, flag_strides):
    if has_bias:
        q_ref, k_ref, v_ref, bias_ref, o_ref, m_sc, l_sc, acc_sc = refs
    else:
        q_ref, k_ref, v_ref, o_ref, m_sc, l_sc, acc_sc = refs
        bias_ref = None

    b = pl.program_id(0)
    hh = pl.program_id(1)
    qi = pl.program_id(2)
    ki = pl.program_id(3)

    @pl.when(ki == 0)
    def _init():
        m_sc[...] = jnp.full_like(m_sc, -jnp.inf)
        l_sc[...] = jnp.zeros_like(l_sc)
        acc_sc[...] = jnp.zeros_like(acc_sc)

    def _update():
        # scores (tq, tk): contract the head dim on the MXU (q pre-scaled by
        # 1/sqrt(d_k) via W_q); bf16 operands, f32 accumulation.
        s = jax.lax.dot_general(
            q_ref[...], k_ref[...],
            dimension_numbers=(((1,), (1,)), ((), ())),
            preferred_element_type=jnp.float32)
        if bias_ref is not None:
            s = s + bias_ref[...].astype(jnp.float32)   # additive 0 / -1e20 bias
        m_prev = m_sc[...]
        m_new = jnp.maximum(m_prev, jnp.max(s, axis=-1, keepdims=True))
        alpha = jnp.exp(m_prev - m_new)
        p = jnp.exp(s - m_new)
        l_sc[...] = alpha * l_sc[...] + jnp.sum(p, axis=-1, keepdims=True)
        acc_sc[...] = alpha * acc_sc[...] + jnp.dot(
            p.astype(v_ref.dtype), v_ref[...], preferred_element_type=jnp.float32)
        m_sc[...] = m_new

    if has_bias:
        # Per-(b,h,qi,ki) "any key unmasked" flag, scalar-prefetched into SMEM.
        # Skipping a fully-masked block is exact for every row that has at
        # least one live key elsewhere (its contribution underflows to 0).
        sb, sh, sq = flag_strides
        live = blk_ref[b * sb + hh * sh + qi * sq + ki] > 0
        pl.when(live)(_update)
    else:
        _update()

    @pl.when(ki == pl.num_programs(3) - 1)
    def _fin():
        l = l_sc[...]
        l = jnp.where(l == 0.0, 1.0, l)   # rows that never accumulated -> zeros
        o_ref[...] = (acc_sc[...] * pl.reciprocal(l, approx=True)).astype(o_ref.dtype)


def _flash_attention(q_in, k_in, v_in, bias, blk_flags, *, h, d_k, fused,
                     col_off, tq, tk, out_dtype=jnp.bfloat16):
    if fused:
        B, Sq_p, _ = q_in.shape
        Sk_p = k_in.shape[1]
    else:
        B, _, Sq_p, _ = q_in.shape
        Sk_p = k_in.shape[2]
    n_q, n_k = Sq_p // tq, Sk_p // tk
    has_bias = bias is not None
    qo, ko, vo = col_off

    if fused:
        # Read head columns straight out of the (B, S, d_model|3*d_model) slab;
        # write a lane-dense (B, S, d_model) output slab.
        q_spec = pl.BlockSpec((None, tq, d_k), lambda b, hh, qi, ki, f: (b, qi, qo + hh))
        k_spec = pl.BlockSpec((None, tk, d_k), lambda b, hh, qi, ki, f: (b, ki, ko + hh))
        v_spec = pl.BlockSpec((None, tk, d_k), lambda b, hh, qi, ki, f: (b, ki, vo + hh))
        o_spec = pl.BlockSpec((None, tq, d_k), lambda b, hh, qi, ki, f: (b, qi, hh))
        out_shape = jax.ShapeDtypeStruct((B, Sq_p, h * d_k), out_dtype)
    else:
        q_spec = pl.BlockSpec((None, None, tq, d_k), lambda b, hh, qi, ki, f: (b, hh, qi, 0))
        k_spec = pl.BlockSpec((None, None, tk, d_k), lambda b, hh, qi, ki, f: (b, hh, ki, 0))
        v_spec = pl.BlockSpec((None, None, tk, d_k), lambda b, hh, qi, ki, f: (b, hh, ki, 0))
        o_spec = pl.BlockSpec((None, None, tq, d_k), lambda b, hh, qi, ki, f: (b, hh, qi, 0))
        out_shape = jax.ShapeDtypeStruct((B, h, Sq_p, d_k), out_dtype)

    in_specs = [q_spec, k_spec, v_spec]
    args = [q_in, k_in, v_in]
    flag_strides = (0, 0, n_k)
    if has_bias:
        B_b, H_b = int(bias.shape[0]), int(bias.shape[1])
        b_spec = pl.BlockSpec(
            (None, None, tq, tk),
            lambda b, hh, qi, ki, f: (b if B_b > 1 else 0,
                                      hh if H_b > 1 else 0, qi, ki))
        in_specs.append(b_spec)
        args.append(bias)
        flag_strides = (H_b * n_q * n_k if B_b > 1 else 0,
                        n_q * n_k if H_b > 1 else 0,
                        n_k)

    kernel = functools.partial(_flash_kernel, has_bias=has_bias,
                               flag_strides=flag_strides)
    return pl.pallas_call(
        kernel,
        out_shape=out_shape,
        grid_spec=pltpu.PrefetchScalarGridSpec(
            num_scalar_prefetch=1,
            grid=(B, h, n_q, n_k),
            in_specs=in_specs,
            out_specs=o_spec,
            scratch_shapes=[
                pltpu.VMEM((tq, 1), jnp.float32),    # running max m
                pltpu.VMEM((tq, 1), jnp.float32),    # running denom l
                pltpu.VMEM((tq, d_k), jnp.float32),  # f32 output accumulator
            ],
        ),
        compiler_params=pltpu.CompilerParams(
            dimension_semantics=("parallel", "parallel", "parallel", "arbitrary"),
            vmem_limit_bytes=_VMEM_LIMIT),
    )(blk_flags, *args)


def _build_bias(mask, Sq, Sk, Sq_p, Sk_p, tq, tk):
    """Additive bf16 bias (0 / -1e20), NOT duplicated per head, plus per-block
    'any key live' int32 flags (flattened) for scalar prefetch."""
    n_q, n_k = Sq_p // tq, Sk_p // tk
    need_pad = (Sq_p != Sq) or (Sk_p != Sk)
    if mask is None and not need_pad:
        return None, jnp.ones((1,), jnp.int32)
    if mask is not None:
        m4 = jnp.asarray(mask)
        while m4.ndim < 4:
            m4 = m4[None]
        B_b, H_b = int(m4.shape[0]), int(m4.shape[1])
        keep = jnp.broadcast_to(m4 != 0, (B_b, H_b, Sq, Sk))
    else:
        B_b = H_b = 1
        keep = jnp.ones((1, 1, Sq, Sk), jnp.bool_)
    keep = jnp.pad(keep, ((0, 0), (0, 0), (0, Sq_p - Sq), (0, Sk_p - Sk)),
                   constant_values=False)
    bias = jnp.where(keep, 0.0, NEG_INF).astype(jnp.bfloat16)
    blk = keep.reshape(B_b, H_b, n_q, tq, n_k, tk).any(axis=(3, 5))
    return bias, blk.astype(jnp.int32).reshape(-1)


# ---------------------------------------------------------------------------
# Parameter preparation: transpose + bf16 cast once, fold 1/sqrt(d_k) into W_q,
# and build the fused QKV weight for self-attention.
# ---------------------------------------------------------------------------
def prepare_params(params, h):
    d_model = params["W_q"].shape[0]
    d_k = d_model // h
    scale = 1.0 / math.sqrt(d_k)
    wq_t = (params["W_q"].astype(jnp.float32).T * scale).astype(jnp.bfloat16)
    wk_t = params["W_k"].T.astype(jnp.bfloat16)
    wv_t = params["W_v"].T.astype(jnp.bfloat16)
    wo_t = params["W_o"].T.astype(jnp.bfloat16)
    bq = (params["b_q"].astype(jnp.float32) * scale)
    bk = params["b_k"].astype(jnp.float32)
    bv = params["b_v"].astype(jnp.float32)
    return {
        "w_q_t": wq_t, "b_q": bq,
        "w_k_t": wk_t, "b_k": bk,
        "w_v_t": wv_t, "b_v": bv,
        "w_o_t": wo_t, "b_o": params["b_o"].astype(jnp.float32),
        "w_qkv_t": jnp.concatenate([wq_t, wk_t, wv_t], axis=1),
        "b_qkv": jnp.concatenate([bq, bk, bv]),
    }


# ---------------------------------------------------------------------------
# Full MultiHeadAttentionBlock forward
# ---------------------------------------------------------------------------
def multi_head_attention_block(q, k, v, mask, prep, h):
    B, Sq, d_model = q.shape
    Sk = k.shape[1]
    assert d_model % h == 0, "d_model must be divisible by number of heads"
    d_k = d_model // h
    fused_heads = (d_k % 128 == 0)          # lane-dense head blocks

    Sq_p = _round_up(Sq, 128)
    Sk_p = _round_up(Sk, 128)
    tq = _tile(Sq_p, 256, 128)
    tk = _tile(Sk_p, 512, 128)

    # ---- projections (bf16 MXU, f32 accumulate); scale folded into W_q ----
    self_attn = (q is k) and (k is v)
    if self_attn and fused_heads:
        qkv = linear(q.reshape(B * Sq, d_model), prep["w_qkv_t"], prep["b_qkv"],
                     out_dtype=jnp.bfloat16).reshape(B, Sq, 3 * d_model)
        qkv = _pad_seq(qkv, Sq_p, axis=1)
        q_in = k_in = v_in = qkv
        col_off = (0, h, 2 * h)             # column-block offsets (units of d_k)
    else:
        q_act = linear(q.reshape(B * Sq, d_model), prep["w_q_t"], prep["b_q"],
                       out_dtype=jnp.bfloat16).reshape(B, Sq, d_model)
        k_act = linear(k.reshape(B * Sk, d_model), prep["w_k_t"], prep["b_k"],
                       out_dtype=jnp.bfloat16).reshape(B, Sk, d_model)
        v_act = linear(v.reshape(B * Sk, d_model), prep["w_v_t"], prep["b_v"],
                       out_dtype=jnp.bfloat16).reshape(B, Sk, d_model)
        if fused_heads:
            q_in = _pad_seq(q_act, Sq_p, axis=1)
            k_in = _pad_seq(k_act, Sk_p, axis=1)
            v_in = _pad_seq(v_act, Sk_p, axis=1)
        else:
            # d_k < 128 fallback: explicit (B, h, S, d_k) head layout.
            q_in = _pad_seq(_split_heads(q_act, h, d_k), Sq_p, axis=2)
            k_in = _pad_seq(_split_heads(k_act, h, d_k), Sk_p, axis=2)
            v_in = _pad_seq(_split_heads(v_act, h, d_k), Sk_p, axis=2)
        col_off = (0, 0, 0)

    # ---- mask -> compact additive bias + per-block live flags ----
    bias, blk_flags = _build_bias(mask, Sq, Sk, Sq_p, Sk_p, tq, tk)

    attn = _flash_attention(q_in, k_in, v_in, bias, blk_flags,
                            h=h, d_k=d_k, fused=fused_heads, col_off=col_off,
                            tq=tq, tk=tk, out_dtype=jnp.bfloat16)

    if fused_heads:
        attn = attn[:, :Sq, :]                               # (B, Sq, d_model)
    else:
        attn = attn.transpose(0, 2, 1, 3).reshape(B, Sq_p, d_model)[:, :Sq, :]

    out = linear(attn.reshape(B * Sq, d_model), prep["w_o_t"], prep["b_o"],
                 out_dtype=jnp.float32)
    return out.reshape(B, Sq, d_model)


# ---------------------------------------------------------------------------
# Pure-JAX reference (mirrors the PyTorch module exactly, f32 throughout)
# ---------------------------------------------------------------------------
def _reference_mha(q, k, v, mask, params, h):
    B, Sq, d_model = q.shape
    Sk = k.shape[1]
    d_k = d_model // h
    lin = lambda x, w, b: x @ w.T + b
    query = lin(q, params["W_q"], params["b_q"]).reshape(B, Sq, h, d_k)
    key = lin(k, params["W_k"], params["b_k"]).reshape(B, Sk, h, d_k)
    value = lin(v, params["W_v"], params["b_v"]).reshape(B, Sk, h, d_k)
    scores = jnp.einsum("nqhd,nkhd->nhqk", query, key)
    if mask is not None:
        scores = jnp.where(mask == 0, NEG_INF, scores)
    attn = jax.nn.softmax(scores / math.sqrt(d_k), axis=3)
    res = jnp.einsum("nhql,nlhd->nqhd", attn, value).reshape(B, Sq, d_model)
    return lin(res, params["W_o"], params["b_o"])


if __name__ == "__main__":
    d_model = 512
    key = jax.random.PRNGKey(0)
    ks = jax.random.split(key, 16)
    winit = 1.0 / math.sqrt(d_model)
    params = {
        "W_q": jax.random.normal(ks[0], (d_model, d_model), jnp.float32) * winit,
        "b_q": jax.random.normal(ks[1], (d_model,), jnp.float32) * 0.02,
        "W_k": jax.random.normal(ks[2], (d_model, d_model), jnp.float32) * winit,
        "b_k": jax.random.normal(ks[3], (d_model,), jnp.float32) * 0.02,
        "W_v": jax.random.normal(ks[4], (d_model, d_model), jnp.float32) * winit,
        "b_v": jax.random.normal(ks[5], (d_model,), jnp.float32) * 0.02,
        "W_o": jax.random.normal(ks[6], (d_model, d_model), jnp.float32) * winit,
        "b_o": jax.random.normal(ks[7], (d_model,), jnp.float32) * 0.02,
    }
    # Tolerance is intentionally loosened vs f32: MXU operands are bf16.
    ATOL = RTOL = 5e-2

    # --- Test A: self-attention, no mask, h=4 (d_k=128 -> fused head layout) ---
    B, S, h = 2, 128, 4
    prep4 = prepare_params(params, h)
    x = jax.random.normal(ks[8], (B, S, d_model), jnp.float32)
    out = jax.block_until_ready(multi_head_attention_block(x, x, x, None, prep4, h))
    ref = _reference_mha(x, x, x, None, params, h)
    assert out.shape == (B, S, d_model)
    assert jnp.allclose(out, ref, atol=ATOL, rtol=RTOL), "test A mismatch"

    # --- Test B: self-attention, causal mask, long seq (exercises block skip) ---
    B, S, h = 2, 1024, 4
    x = jax.random.normal(ks[9], (B, S, d_model), jnp.float32)
    causal = jnp.tril(jnp.ones((S, S), jnp.int32)).reshape(1, 1, S, S)
    out = jax.block_until_ready(multi_head_attention_block(x, x, x, causal, prep4, h))
    ref = _reference_mha(x, x, x, causal, params, h)
    assert jnp.allclose(out, ref, atol=ATOL, rtol=RTOL), "test B mismatch"

    # --- Test C: cross-attention, h=8 (d_k=64 fallback), ragged lens + key-padding mask ---
    B, Sq, Sk, h = 2, 72, 100, 8
    prep8 = prepare_params(params, h)
    qx = jax.random.normal(ks[10], (B, Sq, d_model), jnp.float32)
    kx = jax.random.normal(ks[11], (B, Sk, d_model), jnp.float32)
    vx = jax.random.normal(ks[12], (B, Sk, d_model), jnp.float32)
    valid = jnp.array([70, Sk], jnp.int32)
    kpm = (jnp.arange(Sk)[None, None, None, :] < valid[:, None, None, None]).astype(jnp.int32)
    out = jax.block_until_ready(multi_head_attention_block(qx, kx, vx, kpm, prep8, h))
    ref = _reference_mha(qx, kx, vx, kpm, params, h)
    assert out.shape == (B, Sq, d_model)
    assert jnp.allclose(out, ref, atol=ATOL, rtol=RTOL), "test C mismatch"

    print("KERNEL_OK")
</pallas_src>

<mosaic_0001>
module attributes {stable_mosaic.version = 11 : i64} {
  func.func @_linear_kernel(%arg0: i32, %arg1: i32, %arg2: i32, %arg3: memref<256x512xbf16, #tpu.memory_space<vmem>>, %arg4: memref<512x256xbf16, #tpu.memory_space<vmem>>, %arg5: memref<1x256xf32, #tpu.memory_space<vmem>>, %arg6: memref<256x256xbf16, #tpu.memory_space<vmem>>, %arg7: memref<256x256xf32, #tpu.memory_space<vmem>>) attributes {dimension_semantics = [#tpu.dimension_semantics<parallel>, #tpu.dimension_semantics<parallel>, #tpu.dimension_semantics<arbitrary>], iteration_bounds = array<i64: 1, 6, 1>, scalar_prefetch = 0 : i64, scratch_operands = 1 : i64, tpu.core_type = #tpu.core_type<tc>, window_params = [{transform_indices = @transform_0, window_bounds = array<i64: 256, 512>}, {transform_indices = @transform_1, window_bounds = array<i64: 512, 256>}, {transform_indices = @transform_2, window_bounds = array<i64: 1, 256>}, {transform_indices = @transform_3, window_bounds = array<i64: 256, 256>}]} {
    %c0_i32 = arith.constant 0 : i32
    %0 = arith.cmpi eq, %arg2, %c0_i32 : i32
    %1 = arith.extui %0 : i1 to i32
    %c0_i32_0 = arith.constant 0 : i32
    %2 = arith.cmpi ne, %1, %c0_i32_0 : i32
    scf.if %2 {
      %cst_10 = arith.constant 0.000000e+00 : f32
      %12 = vector.broadcast %cst_10 : f32 to vector<256x256xf32>
      %c0_11 = arith.constant 0 : index
      %c0_12 = arith.constant 0 : index
      %13 = vector.load %arg7[%c0_11, %c0_12] : memref<256x256xf32, #tpu.memory_space<vmem>>, vector<256x256xf32>
      tpu.vector_store %arg7[%c0_11, %c0_12], %12 {strides = array<i32>} : memref<256x256xf32, #tpu.memory_space<vmem>>, vector<256x256xf32>,
    } else {
    }
    %c0 = arith.constant 0 : index
    %c0_1 = arith.constant 0 : index
    %3 = vector.load %arg7[%c0, %c0_1] : memref<256x256xf32, #tpu.memory_space<vmem>>, vector<256x256xf32>
    %c0_2 = arith.constant 0 : index
    %c0_3 = arith.constant 0 : index
    %4 = vector.load %arg3[%c0_2, %c0_3] : memref<256x512xbf16, #tpu.memory_space<vmem>>, vector<256x512xbf16>
    %c0_4 = arith.constant 0 : index
    %c0_5 = arith.constant 0 : index
    %5 = vector.load %arg4[%c0_4, %c0_5] : memref<512x256xbf16, #tpu.memory_space<vmem>>, vector<512x256xbf16>
    %cst = arith.constant dense<0.000000e+00> : vector<256x256xf32>
    %6 = tpu.matmul %4, %5, %cst {dimension_numbers = #tpu.dot_dimension_numbers<[1], [0], [0], [1], [0, 0, 1, 1], [], []>} : vector<256x512xbf16>, vector<512x256xbf16>, vector<256x256xf32> -> vector<256x256xf32>
    %7 = arith.addf %3, %6 : vector<256x256xf32>
    %c0_6 = arith.constant 0 : index
    %c0_7 = arith.constant 0 : index
    %8 = vector.load %arg7[%c0_6, %c0_7] : memref<256x256xf32, #tpu.memory_space<vmem>>, vector<256x256xf32>
    tpu.vector_store %arg7[%c0_6, %c0_7], %7 {strides = array<i32>} : memref<256x256xf32, #tpu.memory_space<vmem>>, vector<256x256xf32>,
    %c0_i32_8 = arith.constant 0 : i32
    %9 = arith.cmpi eq, %arg2, %c0_i32_8 : i32
    %10 = arith.extui %9 : i1 to i32
    %c0_i32_9 = arith.constant 0 : i32
    %11 = arith.cmpi ne, %10, %c0_i32_9 : i32
    scf.if %11 {
      %c0_10 = arith.constant 0 : index
      %c0_11 = arith.constant 0 : index
      %12 = vector.load %arg7[%c0_10, %c0_11] : memref<256x256xf32, #tpu.memory_space<vmem>>, vector<256x256xf32>
      %c0_12 = arith.constant 0 : index
      %c0_13 = arith.constant 0 : index
      %13 = vector.load %arg5[%c0_12, %c0_13] : memref<1x256xf32, #tpu.memory_space<vmem>>, vector<1x256xf32>
      %14 = vector.broadcast %13 : vector<1x256xf32> to vector<256x256xf32>
      %15 = arith.addf %12, %14 : vector<256x256xf32>
      %16 = arith.truncf %15 : vector<256x256xf32> to vector<256x256xbf16>
      %c0_14 = arith.constant 0 : index
      %c0_15 = arith.constant 0 : index
      %17 = vector.load %arg6[%c0_14, %c0_15] : memref<256x256xbf16, #tpu.memory_space<vmem>>, vector<256x256xbf16>
      tpu.vector_store %arg6[%c0_14, %c0_15], %16 {strides = array<i32>} : memref<256x256xbf16, #tpu.memory_space<vmem>>, vector<256x256xbf16>,
    } else {
    }
    return
  }
  func.func @transform_0(%arg0: i32, %arg1: i32, %arg2: i32) -> (i32, i32) {
    %c0_i32 = arith.constant 0 : i32
    return %arg0, %arg2 : i32, i32
  }
  func.func @transform_1(%arg0: i32, %arg1: i32, %arg2: i32) -> (i32, i32) {
    %c0_i32 = arith.constant 0 : i32
    return %arg2, %arg1 : i32, i32
  }
  func.func @transform_2(%arg0: i32, %arg1: i32, %arg2: i32) -> (i32, i32) {
    %c0_i32 = arith.constant 0 : i32
    %c0_i32_0 = arith.constant 0 : i32
    return %c0_i32, %arg1 : i32, i32
  }
  func.func @transform_3(%arg0: i32, %arg1: i32, %arg2: i32) -> (i32, i32) {
    %c0_i32 = arith.constant 0 : i32
    return %arg0, %arg1 : i32, i32
  }
}

</mosaic_0001>

<bundles_post_ra>
// kernel: tpu_custom_call.1
= control target key start
LH: loop header
LB: loop body
LE: loop exit
PB: predicated region body
PF: predicated region fallthrough
CT: control target
= control target key end

     0   :  { %s3402_s0 = inlined_call_operand.hbm [shape: bf16[256,512], index: 0, kind: input, shape index: {}]   ;;  %s3403_s1 = inlined_call_operand.hbm [shape: bf16[512,1536], index: 1, kind: input, shape index: {}]   ;;  %s3404_s2 = inlined_call_operand.hbm [shape: f32[1,1536], index: 2, kind: input, shape index: {}]   ;;  %s3405_s3 = inlined_call_operand.hbm [shape: bf16[256,1536], index: 3, kind: output, shape index: {}]  }
   0x1   :  { %3414 = sst [smem:[#allocation14_spill]] %s3403_s1 }
   0x2   :  { %8 = vsyncpa [#allocation4], 0 }
   0x3   :  { %9 = vsyncpa [#allocation7], 0 }
   0x4   :  { %11 = vsyncpa [#allocation7 + $0x1], 0 }
   0x5   :  { %12 = vsyncpa [#allocation5], 0 }
   0x6   :  { %14 = vsyncpa [#allocation5 + $0x1], 0  ;;  %s2976_s12 = smov 0   ;;  %s2978_s13 = smov 0  }
   0x7   :  { %s2980_s14 = smov 0   ;;  %s2982_s15 = smov 0  }
   0x8   :  { %s2984_s16 = smov 0   ;;  %s2986_s17 = smov 0  }
   0x9 LB: > { %s35_s18 = sadd.s32 1, %s2938_s16  ;;  %s76_s19 = sadd.s32 1, %s2930_s14  ;;  %s2942_s17 = sphi %s2986_s17, %s20_s17   ;;  %s2938_s16 = sphi %s2984_s16, %s3437_s16   ;;  %s2934_s15 = sphi %s2982_s15, %s3436_s15   ;;  %s2930_s14 = sphi %s2980_s14, %s3435_s14   ;;  %s2926_s13 = sphi %s2978_s13, %s3434_s13   ;;  %s2922_s12 = sphi %s2976_s12, %s3433_s12  }
   0xa   : > { %p37_p0 = scmp.ge.s32.totalorder %s35_s18, 6  ;;  %p83_p1 = scmp.ne.s32.totalorder %s2930_s14, %s2926_s13 }
   0xb   : > { %p84_p2 = scmp.eq.s32.totalorder %s2942_s17, 0  ;;  %p2516_p4 = scmp.lt.s32.totalorder %s2942_s17, 6 }
   0xc   : > { %s3439_s18 = smov (%p37_p0, %s35_s18), 0  ;;  %s186_s21 = sand.u32 1, %s2942_s17  }
   0xd   : > { %3415 = sst [smem:[#allocation13_spill]] %s3439_s18  ;;  %p85_p3 = por %p84_p2, %p83_p1 }
   0xe   : > { %s72_s20 = ssub.s32 %s2938_s16, %s3439_s18  ;;  %s188_s22 = sand.u32 1, %s2930_s14  }
   0xf   : > { %p74_p5 = scmp.eq.s32.totalorder %s72_s20, 0  ;;  %s2391_s23 = sshll.u32 %s2938_s16, 7 }
  0x10   : > { %s2215_s25 = sshll.u32 %s188_s22, 9  ;;  %s3416_s1 = sld [smem:[#allocation14_spill]] }
  0x11   : > { %s3023_s24 = scalar_select %p74_p5, %s2930_s14, %s76_s19  }
  0x12   : > { %p3032_p6 = pnand %p2516_p4, %p85_p3  ;;  %s190_s30 = scalar_lea.vmem [#allocation6], %s2215_s25 }
  0x13   : > { %s200_s4 = sshll.u32 %s190_s30, 4  ;;  %s3038_s5 = scalar_lea.sflag [#allocation7], %s186_s21  ;;  %s3036_s4 = int_to_ptr.vmem [resolvable:$true] %s200_s4 }
  0x14   : > { %s3417_s29 = scalar_select %p3032_p6, 1, 0 }
  0x15   : > { %p3408_p8 = pneg %p3032_p6 }
  0x16   : > { %s3030_s28 = scalar_lea.hbm %s3416_s1, %s2391_s23  ;;  %s2773_s9 = scalar_lea.hbm %s3416_s1, 49152 }
  0x17   : > { %s2768_s6 = scalar_lea.hbm %s3030_s28, 8192  ;;  %p2774_p11 = scmp.lt.u32.totalorder %s3030_s28, %s3416_s1 }
  0x18   : > { %p2769_p7 = scmp.ne.s32.totalorder %s3030_s28, %s2768_s6  ;;  %p2775_p12 = scmp.lt.u32.totalorder %s2773_s9, %s2768_s6 }
  0x19   : > { %p2777_p0 = scmp.lt.u32.totalorder %s2768_s6, %s3030_s28 }
  0x1a   : > { %p2771_p9 = pnand %p3408_p8, %p2769_p7  ;;  %p2776_p13 = por %p2775_p12, %p2774_p11 }
  0x1c   : > { %p2772_p10 = pneg %p2771_p9  ;;  %p2778_p2 = por %p2777_p0, %p2776_p13 }
  0x1e   : > { %p2779_p3 = pnand %p2778_p2, %p2772_p10 }
  0x20   : > { %2782 = shalt.err (!%p2779_p3)
}
  0x21   : > { %s2783_s19 = scalar_lea.vmem %s3036_s4, 8192  ;;  %s2944_s20 = smov [#allocation6]  }
  0x22   : > { %p2784_p4 = scmp.ne.s32.totalorder %s3036_s4, %s2783_s19  ;;  %s2788_s21 = sshll.u32 %s2944_s20, 4  ;;  %s2789_s21 = int_to_ptr.vmem [resolvable:$false] %s2788_s21 }
  0x23   : > { %s2790_s23 = scalar_lea.vmem %s2789_s21, 16384  ;;  %p2791_p9 = scmp.lt.s32.totalorder %s3036_s4, %s2789_s21 }
  0x24   : > { %p2786_p5 = pnand %p2784_p4, %p3408_p8  ;;  %p2792_p11 = scmp.lt.s32.totalorder %s2790_s23, %s2783_s19 }
  0x26   : > { %p2787_p7 = pneg %p2786_p5  ;;  %p2793_p12 = por %p2792_p11, %p2791_p9 }
  0x28   : > { %p2794_p13 = pnand %p2793_p12, %p2787_p7 }
  0x2a   : > { %2797 = shalt.err (!%p2794_p13)
}
  0x2b   : > { %s2945_s25 = smov 768   ;;  %s2946_s26 = smov 128  }
  0x2c   : > { %s2947_s27 = smov 8   ;;  %s3067_s30 = sadd.s32 4294967295, %s2942_s17  }
  0x2d   : > { %2507 = dma.hbm_to_vmem [thread:$0]  (!%p3032_p6), %s3030_s28, 8192, %s3036_s4, %s3038_s5, %s2945_s25, %s2946_s26, %s2947_s27  }
  0x2e   : > { %s2211_s6 = sadd.s32 4294967294, %s2942_s17   ;;  %p89_p10 = scmp.ne.s32.totalorder %s2926_s13, %s2922_s12 }
  0x2f   : > { %p3407_p0 = scmp.eq.s32.totalorder %s3067_s30, 0  ;;  %p141_p2 = scmp.eq.s32.totalorder %s3067_s30, 5 }
  0x30   : > { %p147_p3 = scmp.eq.s32.totalorder %s2211_s6, 5  ;;  %p2212_p5 = scmp.ge.s32.totalorder %s2942_s17, 1 }
  0x31   : > { %p3076_p4 = por %p3407_p0, %p89_p10  ;;  %p3084_p7 = por %p141_p2, %p83_p1 }
  0x32   : > { %p3088_p9 = por %p147_p3, %p89_p10  ;;  %p154_p11 = scmp.lt.s32.totalorder %s2942_s17, 7 }
  0x33   : > { %s3418_s7 = scalar_select %p3076_p4, 1, 0 }
  0x34   : > { %s3419_s28 = scalar_select %p3084_p7, 1, 0 }
  0x35   : > { %s3420_s4 = scalar_select %p3088_p9, 1, 0 }
  0x36   : > { %p3093_p12 = pnand %p2212_p5, %p154_p11  ;;  %s2948_s9 = smov [#allocation3]  }
  0x37   : > { %s172_s10 = sshll.u32 %s2948_s9, 4  ;;  %s2218_s11 = sshll.u32 %s188_s22, 1  ;;  %s3097_s10 = int_to_ptr.vmem [resolvable:$true] %s172_s10 }
  0x38   : > { %s3421_s8 = scalar_select %p3093_p12, 1, 0 }
  0x39   : > { %p2500_p13 = pneg %p3093_p12  ;;  %s2392_s19 = sshll.u32 %s2938_s16, 5 }
  0x3a   : > { %s3113_s25 = scalar_lea.hbm %s3404_s2, %s2392_s19  ;;  %s214_s26 = scalar_lea.vmem [#allocation8], %s2218_s11 }
  0x3b   : > { %p3106_p1 = pnand %p2500_p13, %p3407_p0  ;;  %s222_s27 = sshll.u32 %s214_s26, 4  ;;  %s3115_s27 = int_to_ptr.vmem [resolvable:$true] %s222_s27 }
  0x3c   : > { %s2798_s22 = scalar_lea.hbm %s3402_s0, 8192 }
  0x3d   : > { %p2799_p10 = scmp.ne.s32.totalorder %s3402_s0, %s2798_s22  ;;  %p2800_p2 = pneg %p3106_p1 }
  0x3e   : > { %p2805_p11 = scmp.lt.u32.totalorder %s2798_s22, %s3402_s0 }
  0x3f   : > { %p2801_p3 = pnand %p2800_p2, %p2799_p10 }
  0x41   : > { %p2802_p5 = pneg %p2801_p3 }
  0x43   : > { %p2807_p13 = pnand %p2805_p11, %p2802_p5 }
  0x45   : > { %2810 = shalt.err (!%p2807_p13)
}
  0x46   : > { %s2811_s11 = scalar_lea.vmem %s3097_s10, 8192  ;;  %p2819_p7 = scmp.lt.s32.totalorder %s3097_s10, %s3097_s10 }
  0x47   : > { %p2812_p0 = scmp.ne.s32.totalorder %s3097_s10, %s2811_s11  ;;  %p2820_p4 = scmp.lt.s32.totalorder %s2811_s11, %s2811_s11 }
  0x49   : > { %p2814_p8 = pnand %p2812_p0, %p2800_p2  ;;  %p2821_p12 = por %p2820_p4, %p2819_p7 }
  0x4b   : > { %p2815_p9 = pneg %p2814_p8 }
  0x4d   : > { %p2822_p6 = pnand %p2821_p12, %p2815_p9 }
  0x4f   : > { %2825 = shalt.err (!%p2822_p6)
}
  0x50   : > { %s2949_s1 = smov 256   ;;  %s2950_s18 = smov 16  }
  0x51   : > { %2503 = dma.hbm_to_vmem [thread:$0]  (!%p3106_p1), %s3402_s0, 8192, %s3097_s10, [#allocation4], %s2949_s1, %s2949_s1, %s2950_s18  }
  0x52   : > { %s2826_s6 = scalar_lea.hbm %s3113_s25, 32  ;;  %p3423_p0 = scmp.ne.s32.totalorder %s3417_s29, 0 }
  0x53   : > { %p2827_p8 = scmp.ne.s32.totalorder %s3113_s25, %s2826_s6  ;;  %s2831_s21 = scalar_lea.hbm %s3404_s2, 192 }
  0x54   : > { %p3424_p4 = pneg %p3423_p0  ;;  %p2832_p9 = scmp.lt.u32.totalorder %s3113_s25, %s3404_s2 }
  0x55   : > { %p2833_p12 = scmp.lt.u32.totalorder %s2831_s21, %s2826_s6  ;;  %p2835_p2 = scmp.lt.u32.totalorder %s2826_s6, %s3113_s25 }
  0x56   : > { %p2829_p7 = pnand %p2827_p8, %p3424_p4 }
  0x57   : > { %p2834_p10 = por %p2833_p12, %p2832_p9 }
  0x58   : > { %p2830_p6 = pneg %p2829_p7 }
  0x59   : > { %p2836_p3 = por %p2835_p2, %p2834_p10 }
  0x5b   : > { %p2837_p5 = pnand %p2836_p3, %p2830_p6 }
  0x5d   : > { %2840 = shalt.err (!%p2837_p5)
}
  0x5e   : > { %s2841_s10 = scalar_lea.vmem %s3115_s27, 32  ;;  %p3425_p11 = pmov %p3424_p4 }
  0x5f   : > { %p2842_p1 = scmp.ne.s32.totalorder %s3115_s27, %s2841_s10  ;;  %s2951_s20 = smov [#allocation8]  }
  0x60   : > { %s2846_s1 = sshll.u32 %s2951_s20, 4  ;;  %s2847_s1 = int_to_ptr.vmem [resolvable:$false] %s2846_s1 }
  0x61   : > { %p2844_p13 = pnand %p2842_p1, %p3425_p11  ;;  %s2848_s18 = scalar_lea.vmem %s2847_s1, 64 }
  0x62   : > { %p2849_p4 = scmp.lt.s32.totalorder %s3115_s27, %s2847_s1  ;;  %p2850_p7 = scmp.lt.s32.totalorder %s2848_s18, %s2841_s10 }
  0x63   : > { %p2845_p8 = pneg %p2844_p13 }
  0x64   : > { %p2851_p9 = por %p2850_p7, %p2849_p4 }
  0x66   : > { %p2852_p12 = pnand %p2851_p9, %p2845_p8 }
  0x68   : > { %2855 = shalt.err (!%p2852_p12)
}
  0x69   : > { %2510 = dma.hbm_to_vmem [thread:$0]  (!%p3423_p0), %s3113_s25, 32, %s3115_s27, %s3038_s5  }
  0x6a   : > { %p3426_p6 = scmp.ne.s32.totalorder %s3421_s8, 0 }
  0x6b   : > { %p3427_p10 = scmp.eq.s32.totalorder (!%p3426_p6), %s3067_s30, 0 }
  0x6c   : > { %231 = sbr.rel (%p3426_p6) target bundleno = 544 (0x220), region = 32 }
  0x73   : > { %2909 = dma.done.wait (%p3427_p10), [#allocation4], 8192   ;;  %p3428_p2 = pmov %p3427_p10 }
  0x74   : > { %s237_s19 = sand.u32 1, %s3067_s30   ;;  %s3170_s26 = sand.u32 1, %s2926_s13  }
  0x75   : > { %2911 = vsyncadd (%p3428_p2), [#allocation4], 4294959104  ;;  %s2223_s29 = sshll.u32 %s3170_s26, 9  ;;  %s238_s6 = scalar_lea.sflag [#allocation7], %s237_s19 }
  0x76   : > { %s3173_s9 = scalar_lea.vmem [#allocation6], %s2223_s29  ;;  %p3429_p0 = scmp.ne.s32.totalorder %s3418_s7, 0 }
  0x78   : > { %2913 = dma.done.wait (%p3429_p0), %s238_s6, 8224  }
  0x79   : > { %2915 = vsyncadd (%p3429_p0), %s238_s6, 4294959072  ;;  %v2576_v0 = vld [vmem:[%s3173_s9 + $0x4] ss:$8 sps:$4 sm:$0xff]   ;;  %v2580_v2 = vld [vmem:[%s3173_s9] ss:$8 sps:$4 sm:$0xff]   ;;  %s2224_s5 = sshll.u32 %s3170_s26, 1 }
  0x7a   : > { %v2578_v1 = vld [vmem:[%s3173_s9 + $0x104] ss:$8 sps:$4 sm:$0xff]   ;;  %1185 = vmatprep.subr.bf16.mxu1 %v2576_v0  ;;  %v2581_v3 = vld [vmem:[%s3173_s9 + $0x100] ss:$8 sps:$4 sm:$0xff]   ;;  %v2582_v4 = vld [vmem:[%s3173_s9 + $0x14] ss:$8 sps:$4 sm:$0xff]  }
  0x7b   : > { %1378 = vmatprep.subr.bf16.mxu0 %v2578_v1  ;;  %1186 = vmatpush1.bf16.msra.mxu1 %v2580_v2  ;;  %v2584_v5 = vld [vmem:[%s3173_s9 + $0x114] ss:$8 sps:$4 sm:$0xff]   ;;  %v2586_v6 = vld [vmem:[%s3173_s9 + $0x10] ss:$8 sps:$4 sm:$0xff]   ;;  %v2588_v8 = vld [vmem:[%s3173_s9 + $0x24] ss:$8 sps:$4 sm:$0xff]  }
  0x7c   : > { %1379 = vmatpush1.bf16.msra.mxu0 %v2581_v3  ;;  %1187 = vmatprep.subr.bf16.mxu1 %v2582_v4  ;;  %v2587_v7 = vld [vmem:[%s3173_s9 + $0x110] ss:$8 sps:$4 sm:$0xff]   ;;  %v2590_v9 = vld [vmem:[%s3173_s9 + $0x124] ss:$8 sps:$4 sm:$0xff]   ;;  %v2592_v10 = vld [vmem:[%s3173_s9 + $0x20] ss:$8 sps:$4 sm:$0xff]  }
  0x7d   : > { %1380 = vmatprep.subr.bf16.mxu0 %v2584_v5  ;;  %v2593_v11 = vld [vmem:[%s3173_s9 + $0x120] ss:$8 sps:$4 sm:$0xff]   ;;  %v2594_v12 = vld [vmem:[%s3173_s9 + $0x34] ss:$8 sps:$4 sm:$0xff]   ;;  %v2598_v14 = vld [vmem:[%s3173_s9 + $0x30] ss:$8 sps:$4 sm:$0xff]  }
  0x7e   : > { %v2596_v13 = vld [vmem:[%s3173_s9 + $0x134] ss:$8 sps:$4 sm:$0xff]   ;;  %v2599_v15 = vld [vmem:[%s3173_s9 + $0x130] ss:$8 sps:$4 sm:$0xff]   ;;  %v2600_v16 = vld [vmem:[%s3173_s9 + $0x44] ss:$8 sps:$4 sm:$0xff]  }
  0x7f   : > { %1188 = vmatpush1.bf16.msra.mxu1 %v2586_v6  ;;  %v2602_v17 = vld [vmem:[%s3173_s9 + $0x144] ss:$8 sps:$4 sm:$0xff]   ;;  %v2604_v18 = vld [vmem:[%s3173_s9 + $0x40] ss:$8 sps:$4 sm:$0xff]   ;;  %v2606_v20 = vld [vmem:[%s3173_s9 + $0x54] ss:$8 sps:$4 sm:$0xff]  }
  0x80   : > { %1381 = vmatpush1.bf16.msra.mxu0 %v2587_v7  ;;  %1189 = vmatprep.subr.bf16.mxu1 %v2588_v8  ;;  %v2605_v19 = vld [vmem:[%s3173_s9 + $0x140] ss:$8 sps:$4 sm:$0xff]   ;;  %v2608_v21 = vld [vmem:[%s3173_s9 + $0x154] ss:$8 sps:$4 sm:$0xff]   ;;  %v2610_v22 = vld [vmem:[%s3173_s9 + $0x50] ss:$8 sps:$4 sm:$0xff]  }
  0x81   : > { %1382 = vmatprep.subr.bf16.mxu0 %v2590_v9  ;;  %v2611_v23 = vld [vmem:[%s3173_s9 + $0x150] ss:$8 sps:$4 sm:$0xff]   ;;  %v2612_v24 = vld [vmem:[%s3173_s9 + $0x64] ss:$8 sps:$4 sm:$0xff]   ;;  %v2616_v26 = vld [vmem:[%s3173_s9 + $0x60] ss:$8 sps:$4 sm:$0xff]  }
  0x82   : > { %v2614_v25 = vld [vmem:[%s3173_s9 + $0x164] ss:$8 sps:$4 sm:$0xff]   ;;  %v2617_v27 = vld [vmem:[%s3173_s9 + $0x160] ss:$8 sps:$4 sm:$0xff]   ;;  %v2618_v28 = vld [vmem:[%s3173_s9 + $0x74] ss:$8 sps:$4 sm:$0xff]  }
  0x83   : > { %1190 = vmatpush1.bf16.msra.mxu1 %v2592_v10  ;;  %v2620_v29 = vld [vmem:[%s3173_s9 + $0x174] ss:$8 sps:$4 sm:$0xff]   ;;  %v2622_v30 = vld [vmem:[%s3173_s9 + $0x70] ss:$8 sps:$4 sm:$0xff]   ;;  %v2624_v32 = vld [vmem:[%s3173_s9 + $0x84] ss:$8 sps:$4 sm:$0xff]  }
  0x84   : > { %1383 = vmatpush1.bf16.msra.mxu0 %v2593_v11  ;;  %1191 = vmatprep.subr.bf16.mxu1 %v2594_v12  ;;  %v2623_v31 = vld [vmem:[%s3173_s9 + $0x170] ss:$8 sps:$4 sm:$0xff]   ;;  %v2626_v33 = vld [vmem:[%s3173_s9 + $0x184] ss:$8 sps:$4 sm:$0xff]   ;;  %v2628_v34 = vld [vmem:[%s3173_s9 + $0x80] ss:$8 sps:$4 sm:$0xff]  }
  0x85   : > { %1384 = vmatprep.subr.bf16.mxu0 %v2596_v13  ;;  %v2629_v35 = vld [vmem:[%s3173_s9 + $0x180] ss:$8 sps:$4 sm:$0xff]   ;;  %v2630_v36 = vld [vmem:[%s3173_s9 + $0x94] ss:$8 sps:$4 sm:$0xff]   ;;  %v2634_v38 = vld [vmem:[%s3173_s9 + $0x90] ss:$8 sps:$4 sm:$0xff]  }
  0x86   : > { %v2632_v37 = vld [vmem:[%s3173_s9 + $0x194] ss:$8 sps:$4 sm:$0xff]   ;;  %v2635_v39 = vld [vmem:[%s3173_s9 + $0x190] ss:$8 sps:$4 sm:$0xff]   ;;  %v2636_v40 = vld [vmem:[%s3173_s9 + $0xa4] ss:$8 sps:$4 sm:$0xff]  }
  0x87   : > { %1192 = vmatpush1.bf16.msra.mxu1 %v2598_v14  ;;  %v2638_v41 = vld [vmem:[%s3173_s9 + $0x1a4] ss:$8 sps:$4 sm:$0xff]   ;;  %v2640_v42 = vld [vmem:[%s3173_s9 + $0xa0] ss:$8 sps:$4 sm:$0xff]   ;;  %v2642_v44 = vld [vmem:[%s3173_s9 + $0xb4] ss:$8 sps:$4 sm:$0xff]  }
  0x88   : > { %1385 = vmatpush1.bf16.msra.mxu0 %v2599_v15  ;;  %1193 = vmatprep.subr.bf16.mxu1 %v2600_v16  ;;  %v2641_v43 = vld [vmem:[%s3173_s9 + $0x1a0] ss:$8 sps:$4 sm:$0xff]   ;;  %v2644_v45 = vld [vmem:[%s3173_s9 + $0x1b4] ss:$8 sps:$4 sm:$0xff]   ;;  %v2646_v46 = vld [vmem:[%s3173_s9 + $0xb0] ss:$8 sps:$4 sm:$0xff]  }
  0x89   : > { %1386 = vmatprep.subr.bf16.mxu0 %v2602_v17  ;;  %v2647_v47 = vld [vmem:[%s3173_s9 + $0x1b0] ss:$8 sps:$4 sm:$0xff]   ;;  %v2648_v48 = vld [vmem:[%s3173_s9 + $0xc4] ss:$8 sps:$4 sm:$0xff]   ;;  %v2652_v52 = vld [vmem:[%s3173_s9 + $0xc0] ss:$8 sps:$4 sm:$0xff]  }
  0x8a   : > { %v2674_v49 = vld [vmem:[#allocation3 + $0x4] ss:$16 sps:$4 sm:$0xff]   ;;  %v2677_v51 = vld [vmem:[#allocation3 + $0xc] ss:$16 sps:$4 sm:$0xff]   ;;  %v2653_v53 = vld [vmem:[%s3173_s9 + $0x1c0] ss:$8 sps:$4 sm:$0xff]  }
  0x8b   : > { %1194 = vmatpush1.bf16.msra.mxu1 %v2604_v18  ;;  %v2650_v50 = vld [vmem:[%s3173_s9 + $0x1c4] ss:$8 sps:$4 sm:$0xff]   ;;  %1217 = vmatprep.mubr.bf16.mxu1 %v2674_v49  ;;  %v2654_v54 = vld [vmem:[%s3173_s9 + $0xd4] ss:$8 sps:$4 sm:$0xff]   ;;  %v2658_v56 = vld [vmem:[%s3173_s9 + $0xd0] ss:$8 sps:$4 sm:$0xff]  }
  0x8c   : > { %1387 = vmatpush1.bf16.msra.mxu0 %v2605_v19  ;;  %1195 = vmatprep.subr.bf16.mxu1 %v2606_v20  ;;  %v2656_v55 = vld [vmem:[%s3173_s9 + $0x1d4] ss:$8 sps:$4 sm:$0xff]   ;;  %v2659_v57 = vld [vmem:[%s3173_s9 + $0x1d0] ss:$8 sps:$4 sm:$0xff]   ;;  %v2660_v58 = vld [vmem:[%s3173_s9 + $0xe4] ss:$8 sps:$4 sm:$0xff]  }
  0x8d   : > { %1388 = vmatprep.subr.bf16.mxu0 %v2608_v21  ;;  %1410 = vmatprep.mubr.bf16.mxu0 %v2677_v51  ;;  %v2662_v59 = vld [vmem:[%s3173_s9 + $0x1e4] ss:$8 sps:$4 sm:$0xff]   ;;  %v2664_v60 = vld [vmem:[%s3173_s9 + $0xe0] ss:$8 sps:$4 sm:$0xff]   ;;  %v2666_v62 = vld [vmem:[%s3173_s9 + $0xf4] ss:$8 sps:$4 sm:$0xff]  }
  0x8e   : > { %v2665_v61 = vld [vmem:[%s3173_s9 + $0x1e0] ss:$8 sps:$4 sm:$0xff]   ;;  %v2668_v63 = vld [vmem:[%s3173_s9 + $0x1f4] ss:$8 sps:$4 sm:$0xff]   ;;  %v2670_v0 = vld [vmem:[%s3173_s9 + $0xf0] ss:$8 sps:$4 sm:$0xff]  }
  0x8f   : > { %1196 = vmatpush1.bf16.msra.mxu1 %v2610_v22  ;;  %v2671_v1 = vld [vmem:[%s3173_s9 + $0x1f0] ss:$8 sps:$4 sm:$0xff]   ;;  %v2678_v4 = vld [vmem:[#allocation3 + $0x24] ss:$16 sps:$4 sm:$0xff]   ;;  %v2680_v5 = vld [vmem:[#allocation3 + $0x2c] ss:$16 sps:$4 sm:$0xff]  }
  0x90   : > { %1389 = vmatpush1.bf16.msra.mxu0 %v2611_v23  ;;  %1197 = vmatprep.subr.bf16.mxu1 %v2612_v24  ;;  %v2672_v2 = vld [vmem:[#allocation3] ss:$16 sps:$4 sm:$0xff]   ;;  %v2675_v3 = vld [vmem:[#allocation3 + $0x8] ss:$16 sps:$4 sm:$0xff]   ;;  %v2684_v8 = vld [vmem:[#allocation3 + $0x44] ss:$16 sps:$4 sm:$0xff]  }
  0x91   : > { %1390 = vmatprep.subr.bf16.mxu0 %v2614_v25  ;;  %v2682_v6 = vld [vmem:[#allocation3 + $0x20] ss:$16 sps:$4 sm:$0xff]   ;;  %v2683_v7 = vld [vmem:[#allocation3 + $0x28] ss:$16 sps:$4 sm:$0xff]   ;;  %v2686_v9 = vld [vmem:[#allocation3 + $0x4c] ss:$16 sps:$4 sm:$0xff]  }
  0x92   : > { %v2688_v10 = vld [vmem:[#allocation3 + $0x40] ss:$16 sps:$4 sm:$0xff]   ;;  %v2689_v11 = vld [vmem:[#allocation3 + $0x48] ss:$16 sps:$4 sm:$0xff]   ;;  %v2690_v12 = vld [vmem:[#allocation3 + $0x64] ss:$16 sps:$4 sm:$0xff]  }
  0x93   : > { %1198 = vmatpush1.bf16.msra.mxu1 %v2616_v26  ;;  %v2692_v13 = vld [vmem:[#allocation3 + $0x6c] ss:$16 sps:$4 sm:$0xff]   ;;  %v2694_v14 = vld [vmem:[#allocation3 + $0x60] ss:$16 sps:$4 sm:$0xff]   ;;  %v2695_v15 = vld [vmem:[#allocation3 + $0x68] ss:$16 sps:$4 sm:$0xff]  }
  0x94   : > { %1391 = vmatpush1.bf16.msra.mxu0 %v2617_v27  ;;  %1199 = vmatprep.subr.bf16.mxu1 %v2618_v28  ;;  %v2696_v16 = vld [vmem:[#allocation3 + $0x84] ss:$16 sps:$4 sm:$0xff]   ;;  %v2698_v17 = vld [vmem:[#allocation3 + $0x8c] ss:$16 sps:$4 sm:$0xff]   ;;  %v2700_v18 = vld [vmem:[#allocation3 + $0x80] ss:$16 sps:$4 sm:$0xff]  }
  0x95   : > { %1392 = vmatprep.subr.bf16.mxu0 %v2620_v29  ;;  %v2701_v19 = vld [vmem:[#allocation3 + $0x88] ss:$16 sps:$4 sm:$0xff]   ;;  %v2702_v20 = vld [vmem:[#allocation3 + $0xa4] ss:$16 sps:$4 sm:$0xff]   ;;  %v2704_v21 = vld [vmem:[#allocation3 + $0xac] ss:$16 sps:$4 sm:$0xff]  }
  0x96   : > { %v2706_v22 = vld [vmem:[#allocation3 + $0xa0] ss:$16 sps:$4 sm:$0xff]   ;;  %v2707_v23 = vld [vmem:[#allocation3 + $0xa8] ss:$16 sps:$4 sm:$0xff]   ;;  %v2708_v24 = vld [vmem:[#allocation3 + $0xc4] ss:$16 sps:$4 sm:$0xff]  }
  0x97   : > { %1200 = vmatpush1.bf16.msra.mxu1 %v2622_v30  ;;  %v2710_v25 = vld [vmem:[#allocation3 + $0xcc] ss:$16 sps:$4 sm:$0xff]   ;;  %v2712_v26 = vld [vmem:[#allocation3 + $0xc0] ss:$16 sps:$4 sm:$0xff]   ;;  %v2713_v27 = vld [vmem:[#allocation3 + $0xc8] ss:$16 sps:$4 sm:$0xff]  }
  0x98   : > { %1393 = vmatpush1.bf16.msra.mxu0 %v2623_v31  ;;  %1201 = vmatprep.subr.bf16.mxu1 %v2624_v32  ;;  %v2714_v28 = vld [vmem:[#allocation3 + $0xe4] ss:$16 sps:$4 sm:$0xff]   ;;  %v2716_v29 = vld [vmem:[#allocation3 + $0xec] ss:$16 sps:$4 sm:$0xff]   ;;  %v2718_v30 = vld [vmem:[#allocation3 + $0xe0] ss:$16 sps:$4 sm:$0xff]  }
  0x99   : > { %1394 = vmatprep.subr.bf16.mxu0 %v2626_v33  ;;  %v2719_v31 = vld [vmem:[#allocation3 + $0xe8] ss:$16 sps:$4 sm:$0xff]   ;;  %v2720_v32 = vld [vmem:[#allocation3 + $0x104] ss:$16 sps:$4 sm:$0xff]   ;;  %v2722_v33 = vld [vmem:[#allocation3 + $0x10c] ss:$16 sps:$4 sm:$0xff]  }
  0x9a   : > { %v2746_v49 = vld [vmem:[#allocation3 + $0x18c] ss:$16 sps:$4 sm:$0xff]   ;;  %v2749_v51 = vld [vmem:[#allocation3 + $0x188] ss:$16 sps:$4 sm:$0xff]   ;;  %s250_s30 = scalar_lea.vmem [#allocation8], %s2224_s5  ;;  %s2225_s7 = sshll.u32 %s3170_s26, 8 }
  0x9b   : > { %1202 = vmatpush1.bf16.msra.mxu1 %v2628_v34  ;;  %v2724_v34 = vld [vmem:[#allocation3 + $0x100] ss:$16 sps:$4 sm:$0xff]   ;;  %s3253_s8 = scalar_lea.vmem [#allocation9], %s2225_s7  ;;  %s2425_s25 = sshll.u32 %s2934_s15, 7 }
  0x9c   : > { %1395 = vmatpush1.bf16.msra.mxu0 %v2629_v35  ;;  %1203 = vmatprep.subr.bf16.mxu1 %v2630_v36  ;;  %v2725_v35 = vld [vmem:[#allocation3 + $0x108] ss:$16 sps:$4 sm:$0xff]   ;;  %v2726_v36 = vld [vmem:[#allocation3 + $0x124] ss:$16 sps:$4 sm:$0xff]   ;;  %s2083_s27 = sshll.u32 %s3253_s8, 4  ;;  %s3350_s23 = scalar_lea.hbm %s3405_s3, %s2425_s25  ;;  %s3352_s27 = int_to_ptr.vmem [resolvable:$true] %s2083_s27 }
  0x9d   : > { %1396 = vmatprep.subr.bf16.mxu0 %v2632_v37  ;;  %v2728_v37 = vld [vmem:[#allocation3 + $0x12c] ss:$16 sps:$4 sm:$0xff]   ;;  %s2067_s15 = scalar_lea.sflag [#allocation5], %s3170_s26  ;;  %s2856_s11 = scalar_lea.vmem %s3352_s27, 4096 }
  0x9e   : > { %p2857_p3 = scmp.ne.s32.totalorder %s3352_s27, %s2856_s11  ;;  %p3430_p5 = scmp.ne.s32.totalorder %s3419_s28, 0 }
  0x9f   : > { %1204 = vmatpush1.bf16.msra.mxu1 %v2634_v38  ;;  %v2730_v38 = vld [vmem:[#allocation3 + $0x120] ss:$16 sps:$4 sm:$0xff]   ;;  %s2952_s10 = smov [#allocation9]  }
  0xa0   : > { %1397 = vmatpush1.bf16.msra.mxu0 %v2635_v39  ;;  %1205 = vmatprep.subr.bf16.mxu1 %v2636_v40  ;;  %v2731_v39 = vld [vmem:[#allocation3 + $0x128] ss:$16 sps:$4 sm:$0xff]   ;;  %v2732_v40 = vld [vmem:[#allocation3 + $0x144] ss:$16 sps:$4 sm:$0xff]   ;;  %p2858_p1 = pnand %p2857_p3, %p3430_p5  ;;  %s2860_s20 = sshll.u32 %s2952_s10, 4  ;;  %s2861_s20 = int_to_ptr.vmem [resolvable:$false] %s2860_s20 }
  0xa1   : > { %1398 = vmatprep.subr.bf16.mxu0 %v2638_v41  ;;  %v2734_v41 = vld [vmem:[#allocation3 + $0x14c] ss:$16 sps:$4 sm:$0xff]   ;;  %s2862_s1 = scalar_lea.vmem %s2861_s20, 8192  ;;  %p2863_p13 = scmp.lt.s32.totalorder %s3352_s27, %s2861_s20 }
  0xa2   : > { %p2859_p11 = pneg %p2858_p1  ;;  %p2864_p8 = scmp.lt.s32.totalorder %s2862_s1, %s2856_s11 }
  0xa3   : > { %1206 = vmatpush1.bf16.msra.mxu1 %v2640_v42  ;;  %v2736_v42 = vld [vmem:[#allocation3 + $0x140] ss:$16 sps:$4 sm:$0xff]  }
  0xa4   : > { %1399 = vmatpush1.bf16.msra.mxu0 %v2641_v43  ;;  %1207 = vmatprep.subr.bf16.mxu1 %v2642_v44  ;;  %v2737_v43 = vld [vmem:[#allocation3 + $0x148] ss:$16 sps:$4 sm:$0xff]   ;;  %v2738_v44 = vld [vmem:[#allocation3 + $0x164] ss:$16 sps:$4 sm:$0xff]   ;;  %p2865_p4 = por %p2864_p8, %p2863_p13 }
  0xa5   : > { %1400 = vmatprep.subr.bf16.mxu0 %v2644_v45  ;;  %v2740_v45 = vld [vmem:[#allocation3 + $0x16c] ss:$16 sps:$4 sm:$0xff]  }
  0xa6   : > { %p2866_p7 = pnand %p2865_p4, %p2859_p11 }
  0xa7   : > { %1208 = vmatpush1.bf16.msra.mxu1 %v2646_v46  ;;  %v2742_v46 = vld [vmem:[#allocation3 + $0x160] ss:$16 sps:$4 sm:$0xff]  }
  0xa8   : > { %1401 = vmatpush1.bf16.msra.mxu0 %v2647_v47  ;;  %1209 = vmatprep.subr.bf16.mxu1 %v2648_v48  ;;  %v2743_v47 = vld [vmem:[#allocation3 + $0x168] ss:$16 sps:$4 sm:$0xff]   ;;  %v2744_v48 = vld [vmem:[#allocation3 + $0x184] ss:$16 sps:$4 sm:$0xff]  }
  0xa9   : > { %1402 = vmatprep.subr.bf16.mxu0 %v2650_v50  ;;  %v2748_v50 = vld [vmem:[#allocation3 + $0x180] ss:$16 sps:$4 sm:$0xff]  }
  0xab   : > { %1210 = vmatpush1.bf16.msra.mxu1 %v2652_v52  ;;  %v2750_v52 = vld [vmem:[#allocation3 + $0x1a4] ss:$16 sps:$4 sm:$0xff]  }
  0xac   : > { %1403 = vmatpush1.bf16.msra.mxu0 %v2653_v53  ;;  %1211 = vmatprep.subr.bf16.mxu1 %v2654_v54  ;;  %v2752_v53 = vld [vmem:[#allocation3 + $0x1ac] ss:$16 sps:$4 sm:$0xff]   ;;  %v2754_v54 = vld [vmem:[#allocation3 + $0x1a0] ss:$16 sps:$4 sm:$0xff]  }
  0xad   : > { %1404 = vmatprep.subr.bf16.mxu0 %v2656_v55  ;;  %v2755_v55 = vld [vmem:[#allocation3 + $0x1a8] ss:$16 sps:$4 sm:$0xff]  }
  0xaf   : > { %1212 = vmatpush1.bf16.msra.mxu1 %v2658_v56  ;;  %v2756_v56 = vld [vmem:[#allocation3 + $0x1c4] ss:$16 sps:$4 sm:$0xff]  }
  0xb0   : > { %1405 = vmatpush1.bf16.msra.mxu0 %v2659_v57  ;;  %1213 = vmatprep.subr.bf16.mxu1 %v2660_v58  ;;  %v2758_v57 = vld [vmem:[#allocation3 + $0x1cc] ss:$16 sps:$4 sm:$0xff]   ;;  %v2760_v58 = vld [vmem:[#allocation3 + $0x1c0] ss:$16 sps:$4 sm:$0xff]  }
  0xb1   : > { %1406 = vmatprep.subr.bf16.mxu0 %v2662_v59  ;;  %v2761_v59 = vld [vmem:[#allocation3 + $0x1c8] ss:$16 sps:$4 sm:$0xff]  }
  0xb3   : > { %1214 = vmatpush1.bf16.msra.mxu1 %v2664_v60  ;;  %v2762_v60 = vld [vmem:[#allocation3 + $0x1e4] ss:$16 sps:$4 sm:$0xff]  }
  0xb4   : > { %1407 = vmatpush1.bf16.msra.mxu0 %v2665_v61  ;;  %1215 = vmatprep.subr.bf16.mxu1 %v2666_v62  ;;  %v2764_v61 = vld [vmem:[#allocation3 + $0x1ec] ss:$16 sps:$4 sm:$0xff]   ;;  %v2766_v62 = vld [vmem:[#allocation3 + $0x1e0] ss:$16 sps:$4 sm:$0xff]  }
  0xb5   : > { %1408 = vmatprep.subr.bf16.mxu0 %v2668_v63  ;;  %v2767_v63 = vld [vmem:[#allocation3 + $0x1e8] ss:$16 sps:$4 sm:$0xff]  }
  0xb7   : > { %1216 = vmatpush1.bf16.msra.mxu1 %v2670_v0  ;;  %v1768_v0 = vlaneseq }
  0xb8   : > { %1409 = vmatpush1.bf16.msra.mxu0 %v2671_v1 }
  0xb9   : > { %v1769_v1 = vshrl.u32 %v1768_v0, 7 }
  0xba   : > { %1218 = vmatmul.mubr.bf16.vlgmr.msra.gmra.mrb[0].mxu1 %v2672_v2 }
  0xbb   : > { %1411 = vmatmul.mubr.bf16.vlgmr.msra.gmra.mrb[0].mxu0 %v2675_v3  ;;  %1227 = vmatprep.mubr.bf16.mxu1 %v2678_v4  ;;  %v1770_v2 = vsub.s32 0, %v1769_v1  ;;  %v1766_v3 = vld [vmem:[%s250_s30] sm:$0x3]  ;;  %v1774_v4 = vsub.s32 1, %v1769_v1 }
  0xbc   : > { %1420 = vmatprep.mubr.bf16.mxu0 %v2680_v5 }
  0xbd   : > { %v3244_v5 = vrot.slane %v1766_v3, %v1770_v2 }
  0xc2   : > { %1228 = vmatmul.mubr.bf16.gmra.mrb[4].mxu1 %v2682_v6 }
  0xc3   : > { %1421 = vmatmul.mubr.bf16.gmra.mrb[4].mxu0 %v2683_v7  ;;  %1237 = vmatprep.mubr.bf16.mxu1 %v2684_v8  ;;  %v3246_v8 = vrot.slane %v1766_v3, %v1774_v4 }
  0xc4   : > { %1430 = vmatprep.mubr.bf16.mxu0 %v2686_v9 }
  0xca   : > { %1238 = vmatmul.mubr.bf16.gmra.mrb[8].mxu1 %v2688_v10 }
  0xcb   : > { %1431 = vmatmul.mubr.bf16.gmra.mrb[8].mxu0 %v2689_v11  ;;  %1247 = vmatprep.mubr.bf16.mxu1 %v2690_v12 }
  0xcc   : > { %1440 = vmatprep.mubr.bf16.mxu0 %v2692_v13 }
  0xd2   : > { %1248 = vmatmul.mubr.bf16.gmra.mrb[12].mxu1 %v2694_v14 }
  0xd3   : > { %1441 = vmatmul.mubr.bf16.gmra.mrb[12].mxu0 %v2695_v15  ;;  %1257 = vmatprep.mubr.bf16.mxu1 %v2696_v16 }
  0xd4   : > { %1450 = vmatprep.mubr.bf16.mxu0 %v2698_v17 }
  0xda   : > { %1258 = vmatmul.mubr.bf16.gmra.mrb[16].mxu1 %v2700_v18 }
  0xdb   : > { %1451 = vmatmul.mubr.bf16.gmra.mrb[16].mxu0 %v2701_v19  ;;  %1267 = vmatprep.mubr.bf16.mxu1 %v2702_v20 }
  0xdc   : > { %1460 = vmatprep.mubr.bf16.mxu0 %v2704_v21 }
  0xe2   : > { %1268 = vmatmul.mubr.bf16.gmra.mrb[20].mxu1 %v2706_v22 }
  0xe3   : > { %1461 = vmatmul.mubr.bf16.gmra.mrb[20].mxu0 %v2707_v23  ;;  %1277 = vmatprep.mubr.bf16.mxu1 %v2708_v24 }
  0xe4   : > { %1470 = vmatprep.mubr.bf16.mxu0 %v2710_v25 }
  0xea   : > { %1278 = vmatmul.mubr.bf16.gmra.mrb[24].mxu1 %v2712_v26 }
  0xeb   : > { %1471 = vmatmul.mubr.bf16.gmra.mrb[24].mxu0 %v2713_v27  ;;  %1287 = vmatprep.mubr.bf16.mxu1 %v2714_v28 }
  0xec   : > { %1480 = vmatprep.mubr.bf16.mxu0 %v2716_v29 }
  0xf2   : > { %1288 = vmatmul.mubr.bf16.gmra.mrb[28].mxu1 %v2718_v30 }
  0xf3   : > { %1481 = vmatmul.mubr.bf16.gmra.mrb[28].mxu0 %v2719_v31  ;;  %1297 = vmatprep.mubr.bf16.mxu1 %v2720_v32 }
  0xf4   : > { %1490 = vmatprep.mubr.bf16.mxu0 %v2722_v33 }
  0xfa   : > { %1298 = vmatmul.mubr.bf16.gmra.mrb[32].mxu1 %v2724_v34 }
  0xfb   : > { %1491 = vmatmul.mubr.bf16.gmra.mrb[32].mxu0 %v2725_v35  ;;  %1307 = vmatprep.mubr.bf16.mxu1 %v2726_v36 }
  0xfc   : > { %1500 = vmatprep.mubr.bf16.mxu0 %v2728_v37 }
 0x102   : > { %1308 = vmatmul.mubr.bf16.gmra.mrb[36].mxu1 %v2730_v38 }
 0x103   : > { %1501 = vmatmul.mubr.bf16.gmra.mrb[36].mxu0 %v2731_v39  ;;  %1317 = vmatprep.mubr.bf16.mxu1 %v2732_v40 }
 0x104   : > { %1510 = vmatprep.mubr.bf16.mxu0 %v2734_v41 }
 0x10a   : > { %1318 = vmatmul.mubr.bf16.gmra.mrb[40].mxu1 %v2736_v42 }
 0x10b   : > { %1511 = vmatmul.mubr.bf16.gmra.mrb[40].mxu0 %v2737_v43  ;;  %1327 = vmatprep.mubr.bf16.mxu1 %v2738_v44 }
 0x10c   : > { %1520 = vmatprep.mubr.bf16.mxu0 %v2740_v45 }
 0x112   : > { %1328 = vmatmul.mubr.bf16.gmra.mrb[44].mxu1 %v2742_v46 }
 0x113   : > { %1521 = vmatmul.mubr.bf16.gmra.mrb[44].mxu0 %v2743_v47  ;;  %1337 = vmatprep.mubr.bf16.mxu1 %v2744_v48 }
 0x114   : > { %1530 = vmatprep.mubr.bf16.mxu0 %v2746_v49 }
 0x11a   : > { %1338 = vmatmul.mubr.bf16.gmra.mrb[48].mxu1 %v2748_v50 }
 0x11b   : > { %1531 = vmatmul.mubr.bf16.gmra.mrb[48].mxu0 %v2749_v51  ;;  %1347 = vmatprep.mubr.bf16.mxu1 %v2750_v52 }
 0x11c   : > { %1540 = vmatprep.mubr.bf16.mxu0 %v2752_v53 }
 0x122   : > { %1348 = vmatmul.mubr.bf16.gmra.mrb[52].mxu1 %v2754_v54 }
 0x123   : > { %1541 = vmatmul.mubr.bf16.gmra.mrb[52].mxu0 %v2755_v55  ;;  %1357 = vmatprep.mubr.bf16.mxu1 %v2756_v56 }
 0x124   : > { %1550 = vmatprep.mubr.bf16.mxu0 %v2758_v57 }
 0x12a   : > { %1358 = vmatmul.mubr.bf16.gmra.mrb[56].mxu1 %v2760_v58 }
 0x12b   : > { %1551 = vmatmul.mubr.bf16.gmra.mrb[56].mxu0 %v2761_v59  ;;  %1367 = vmatprep.mubr.bf16.mxu1 %v2762_v60 }
 0x12c   : > { %1560 = vmatprep.mubr.bf16.mxu0 %v2764_v61 }
 0x132   : > { %1368 = vmatmul.mubr.bf16.gmra.mrb[60].mxu1 %v2766_v62 }
 0x133   : > { %1561 = vmatmul.mubr.bf16.gmra.mrb[60].mxu0 %v2767_v63 }
 0x18d   : > { %v1219_v6 = vpop.f32.mrb[0].mxu1 }
 0x18e   : > { %v1412_v7 = vpop.f32.mrb[0].mxu0  ;;  %v1221_v10 = vpop.f32.mrb[1].mxu1 }
 0x18f   : > { %v1413_v9 = vadd.f32 %v1412_v7, %v1219_v6  ;;  %v1414_v11 = vpop.f32.mrb[1].mxu0  ;;  %v1223_v13 = vpop.f32.mrb[2].mxu1 }
 0x190   : > { %v1415_v12 = vadd.f32 %v1414_v11, %v1221_v10  ;;  %v1416_v14 = vpop.f32.mrb[2].mxu0  ;;  %v1225_v17 = vpop.f32.mrb[3].mxu1 }
 0x191   : > { %v1778_v15 = vadd.f32 %v3244_v5, %v1413_v9  ;;  %v1417_v16 = vadd.f32 %v1416_v14, %v1223_v13  ;;  %v1418_v18 = vpop.f32.mrb[3].mxu0 }
 0x192   : > { %v1779_v19 = vadd.f32 %v3246_v8, %v1415_v12  ;;  %v1419_v20 = vadd.f32 %v1418_v18, %v1225_v17 }
 0x193   : > { %v1780_v21 = vadd.f32 %v3244_v5, %v1417_v16 }
 0x194   : > { %v2393_v22 = vpack.c.bf16 %v1779_v19, %v1778_v15  ;;  %v1781_v23 = vadd.f32 %v3246_v8, %v1419_v20 }
 0x195   : > { %v1229_v25 = vpop.f32.mrb[4].mxu1 }
 0x196   : > { %2034 = vst [vmem:[%s3253_s8] sm:$0xff] %v2393_v22  ;;  %v2394_v24 = vpack.c.bf16 %v1781_v23, %v1780_v21  ;;  %v1422_v26 = vpop.f32.mrb[4].mxu0  ;;  %v1231_v28 = vpop.f32.mrb[5].mxu1 }
 0x197   : > { %v1423_v27 = vadd.f32 %v1422_v26, %v1229_v25  ;;  %v1424_v29 = vpop.f32.mrb[5].mxu0  ;;  %v1233_v31 = vpop.f32.mrb[6].mxu1 }
 0x198   : > { %2035 = vst [vmem:[%s3253_s8 + $0x8] sm:$0xff] %v2394_v24  ;;  %v1425_v30 = vadd.f32 %v1424_v29, %v1231_v28  ;;  %v1426_v32 = vpop.f32.mrb[6].mxu0  ;;  %v1235_v35 = vpop.f32.mrb[7].mxu1 }
 0x199   : > { %v1782_v33 = vadd.f32 %v3244_v5, %v1423_v27  ;;  %v1427_v34 = vadd.f32 %v1426_v32, %v1233_v31  ;;  %v1428_v36 = vpop.f32.mrb[7].mxu0 }
 0x19a   : > { %v1783_v37 = vadd.f32 %v3246_v8, %v1425_v30  ;;  %v1429_v38 = vadd.f32 %v1428_v36, %v1235_v35 }
 0x19b   : > { %v1784_v39 = vadd.f32 %v3244_v5, %v1427_v34 }
 0x19c   : > { %v2395_v40 = vpack.c.bf16 %v1783_v37, %v1782_v33  ;;  %v1785_v41 = vadd.f32 %v3246_v8, %v1429_v38 }
 0x19d   : > { %v1239_v43 = vpop.f32.mrb[8].mxu1 }
 0x19e   : > { %2036 = vst [vmem:[%s3253_s8 + $0x10] sm:$0xff] %v2395_v40  ;;  %v2396_v42 = vpack.c.bf16 %v1785_v41, %v1784_v39  ;;  %v1432_v44 = vpop.f32.mrb[8].mxu0  ;;  %v1241_v46 = vpop.f32.mrb[9].mxu1 }
 0x19f   : > { %v1433_v45 = vadd.f32 %v1432_v44, %v1239_v43  ;;  %v1434_v47 = vpop.f32.mrb[9].mxu0  ;;  %v1243_v49 = vpop.f32.mrb[10].mxu1 }
 0x1a0   : > { %2037 = vst [vmem:[%s3253_s8 + $0x18] sm:$0xff] %v2396_v42  ;;  %v1435_v48 = vadd.f32 %v1434_v47, %v1241_v46  ;;  %v1436_v50 = vpop.f32.mrb[10].mxu0  ;;  %v1245_v53 = vpop.f32.mrb[11].mxu1 }
 0x1a1   : > { %v1786_v51 = vadd.f32 %v3244_v5, %v1433_v45  ;;  %v1437_v52 = vadd.f32 %v1436_v50, %v1243_v49  ;;  %v1438_v54 = vpop.f32.mrb[11].mxu0 }
 0x1a2   : > { %v1787_v55 = vadd.f32 %v3246_v8, %v1435_v48  ;;  %v1439_v56 = vadd.f32 %v1438_v54, %v1245_v53 }
 0x1a3   : > { %v1788_v57 = vadd.f32 %v3244_v5, %v1437_v52 }
 0x1a4   : > { %v2397_v58 = vpack.c.bf16 %v1787_v55, %v1786_v51  ;;  %v1789_v59 = vadd.f32 %v3246_v8, %v1439_v56 }
 0x1a5   : > { %v1249_v61 = vpop.f32.mrb[12].mxu1 }
 0x1a6   : > { %2038 = vst [vmem:[%s3253_s8 + $0x20] sm:$0xff] %v2397_v58  ;;  %v2398_v60 = vpack.c.bf16 %v1789_v59, %v1788_v57  ;;  %v1442_v62 = vpop.f32.mrb[12].mxu0  ;;  %v1251_v0 = vpop.f32.mrb[13].mxu1 }
 0x1a7   : > { %v1443_v63 = vadd.f32 %v1442_v62, %v1249_v61  ;;  %v1444_v1 = vpop.f32.mrb[13].mxu0  ;;  %v1253_v3 = vpop.f32.mrb[14].mxu1 }
 0x1a8   : > { %2039 = vst [vmem:[%s3253_s8 + $0x28] sm:$0xff] %v2398_v60  ;;  %v1445_v2 = vadd.f32 %v1444_v1, %v1251_v0  ;;  %v1446_v4 = vpop.f32.mrb[14].mxu0  ;;  %v1255_v9 = vpop.f32.mrb[15].mxu1 }
 0x1a9   : > { %v1790_v6 = vadd.f32 %v3244_v5, %v1443_v63  ;;  %v1447_v7 = vadd.f32 %v1446_v4, %v1253_v3  ;;  %v1448_v10 = vpop.f32.mrb[15].mxu0 }
 0x1aa   : > { %v1791_v11 = vadd.f32 %v3246_v8, %v1445_v2  ;;  %v1449_v12 = vadd.f32 %v1448_v10, %v1255_v9 }
 0x1ab   : > { %v1792_v13 = vadd.f32 %v3244_v5, %v1447_v7 }
 0x1ac   : > { %v2399_v14 = vpack.c.bf16 %v1791_v11, %v1790_v6  ;;  %v1793_v15 = vadd.f32 %v3246_v8, %v1449_v12 }
 0x1ad   : > { %v1259_v17 = vpop.f32.mrb[16].mxu1 }
 0x1ae   : > { %2040 = vst [vmem:[%s3253_s8 + $0x30] sm:$0xff] %v2399_v14  ;;  %v2400_v16 = vpack.c.bf16 %v1793_v15, %v1792_v13  ;;  %v1452_v18 = vpop.f32.mrb[16].mxu0  ;;  %v1261_v20 = vpop.f32.mrb[17].mxu1 }
 0x1af   : > { %v1453_v19 = vadd.f32 %v1452_v18, %v1259_v17  ;;  %v1454_v21 = vpop.f32.mrb[17].mxu0  ;;  %v1263_v23 = vpop.f32.mrb[18].mxu1 }
 0x1b0   : > { %2041 = vst [vmem:[%s3253_s8 + $0x38] sm:$0xff] %v2400_v16  ;;  %v1455_v22 = vadd.f32 %v1454_v21, %v1261_v20  ;;  %v1456_v24 = vpop.f32.mrb[18].mxu0  ;;  %v1265_v27 = vpop.f32.mrb[19].mxu1 }
 0x1b1   : > { %v1794_v25 = vadd.f32 %v3244_v5, %v1453_v19  ;;  %v1457_v26 = vadd.f32 %v1456_v24, %v1263_v23  ;;  %v1458_v28 = vpop.f32.mrb[19].mxu0 }
 0x1b2   : > { %v1795_v29 = vadd.f32 %v3246_v8, %v1455_v22  ;;  %v1459_v30 = vadd.f32 %v1458_v28, %v1265_v27 }
 0x1b3   : > { %v1796_v31 = vadd.f32 %v3244_v5, %v1457_v26 }
 0x1b4   : > { %v2401_v32 = vpack.c.bf16 %v1795_v29, %v1794_v25  ;;  %v1797_v33 = vadd.f32 %v3246_v8, %v1459_v30 }
 0x1b5   : > { %v1269_v35 = vpop.f32.mrb[20].mxu1 }
 0x1b6   : > { %2042 = vst [vmem:[%s3253_s8 + $0x40] sm:$0xff] %v2401_v32  ;;  %v2402_v34 = vpack.c.bf16 %v1797_v33, %v1796_v31  ;;  %v1462_v36 = vpop.f32.mrb[20].mxu0  ;;  %v1271_v38 = vpop.f32.mrb[21].mxu1 }
 0x1b7   : > { %v1463_v37 = vadd.f32 %v1462_v36, %v1269_v35  ;;  %v1464_v39 = vpop.f32.mrb[21].mxu0  ;;  %v1273_v41 = vpop.f32.mrb[22].mxu1 }
 0x1b8   : > { %2043 = vst [vmem:[%s3253_s8 + $0x48] sm:$0xff] %v2402_v34  ;;  %v1465_v40 = vadd.f32 %v1464_v39, %v1271_v38  ;;  %v1466_v42 = vpop.f32.mrb[22].mxu0  ;;  %v1275_v45 = vpop.f32.mrb[23].mxu1 }
 0x1b9   : > { %v1798_v43 = vadd.f32 %v3244_v5, %v1463_v37  ;;  %v1467_v44 = vadd.f32 %v1466_v42, %v1273_v41  ;;  %v1468_v46 = vpop.f32.mrb[23].mxu0 }
 0x1ba   : > { %v1799_v47 = vadd.f32 %v3246_v8, %v1465_v40  ;;  %v1469_v48 = vadd.f32 %v1468_v46, %v1275_v45 }
 0x1bb   : > { %v1800_v49 = vadd.f32 %v3244_v5, %v1467_v44 }
 0x1bc   : > { %v2403_v50 = vpack.c.bf16 %v1799_v47, %v1798_v43  ;;  %v1801_v51 = vadd.f32 %v3246_v8, %v1469_v48 }
 0x1bd   : > { %v1279_v53 = vpop.f32.mrb[24].mxu1 }
 0x1be   : > { %2044 = vst [vmem:[%s3253_s8 + $0x50] sm:$0xff] %v2403_v50  ;;  %v2404_v52 = vpack.c.bf16 %v1801_v51, %v1800_v49  ;;  %v1472_v54 = vpop.f32.mrb[24].mxu0  ;;  %v1281_v56 = vpop.f32.mrb[25].mxu1 }
 0x1bf   : > { %v1473_v55 = vadd.f32 %v1472_v54, %v1279_v53  ;;  %v1474_v57 = vpop.f32.mrb[25].mxu0  ;;  %v1283_v59 = vpop.f32.mrb[26].mxu1 }
 0x1c0   : > { %2045 = vst [vmem:[%s3253_s8 + $0x58] sm:$0xff] %v2404_v52  ;;  %v1475_v58 = vadd.f32 %v1474_v57, %v1281_v56  ;;  %v1476_v60 = vpop.f32.mrb[26].mxu0  ;;  %v1285_v63 = vpop.f32.mrb[27].mxu1 }
 0x1c1   : > { %v1802_v61 = vadd.f32 %v3244_v5, %v1473_v55  ;;  %v1477_v62 = vadd.f32 %v1476_v60, %v1283_v59  ;;  %v1478_v0 = vpop.f32.mrb[27].mxu0 }
 0x1c2   : > { %v1803_v1 = vadd.f32 %v3246_v8, %v1475_v58  ;;  %v1479_v2 = vadd.f32 %v1478_v0, %v1285_v63 }
 0x1c3   : > { %v1804_v3 = vadd.f32 %v3244_v5, %v1477_v62 }
 0x1c4   : > { %v2405_v4 = vpack.c.bf16 %v1803_v1, %v1802_v61  ;;  %v1805_v6 = vadd.f32 %v3246_v8, %v1479_v2 }
 0x1c5   : > { %v1289_v9 = vpop.f32.mrb[28].mxu1 }
 0x1c6   : > { %2046 = vst [vmem:[%s3253_s8 + $0x60] sm:$0xff] %v2405_v4  ;;  %v2406_v7 = vpack.c.bf16 %v1805_v6, %v1804_v3  ;;  %v1482_v10 = vpop.f32.mrb[28].mxu0  ;;  %v1291_v12 = vpop.f32.mrb[29].mxu1 }
 0x1c7   : > { %v1483_v11 = vadd.f32 %v1482_v10, %v1289_v9  ;;  %v1484_v13 = vpop.f32.mrb[29].mxu0  ;;  %v1293_v15 = vpop.f32.mrb[30].mxu1 }
 0x1c8   : > { %2047 = vst [vmem:[%s3253_s8 + $0x68] sm:$0xff] %v2406_v7  ;;  %v1485_v14 = vadd.f32 %v1484_v13, %v1291_v12  ;;  %v1486_v16 = vpop.f32.mrb[30].mxu0  ;;  %v1295_v19 = vpop.f32.mrb[31].mxu1 }
 0x1c9   : > { %v1806_v17 = vadd.f32 %v3244_v5, %v1483_v11  ;;  %v1487_v18 = vadd.f32 %v1486_v16, %v1293_v15  ;;  %v1488_v20 = vpop.f32.mrb[31].mxu0 }
 0x1ca   : > { %v1807_v21 = vadd.f32 %v3246_v8, %v1485_v14  ;;  %v1489_v22 = vadd.f32 %v1488_v20, %v1295_v19 }
 0x1cb   : > { %v1808_v23 = vadd.f32 %v3244_v5, %v1487_v18 }
 0x1cc   : > { %v2407_v24 = vpack.c.bf16 %v1807_v21, %v1806_v17  ;;  %v1809_v25 = vadd.f32 %v3246_v8, %v1489_v22 }
 0x1cd   : > { %v1299_v27 = vpop.f32.mrb[32].mxu1 }
 0x1ce   : > { %2048 = vst [vmem:[%s3253_s8 + $0x70] sm:$0xff] %v2407_v24  ;;  %v2408_v26 = vpack.c.bf16 %v1809_v25, %v1808_v23  ;;  %v1492_v28 = vpop.f32.mrb[32].mxu0  ;;  %v1301_v30 = vpop.f32.mrb[33].mxu1 }
 0x1cf   : > { %v1493_v29 = vadd.f32 %v1492_v28, %v1299_v27  ;;  %v1494_v31 = vpop.f32.mrb[33].mxu0  ;;  %v1303_v33 = vpop.f32.mrb[34].mxu1 }
 0x1d0   : > { %2049 = vst [vmem:[%s3253_s8 + $0x78] sm:$0xff] %v2408_v26  ;;  %v1495_v32 = vadd.f32 %v1494_v31, %v1301_v30  ;;  %v1496_v34 = vpop.f32.mrb[34].mxu0  ;;  %v1305_v37 = vpop.f32.mrb[35].mxu1 }
 0x1d1   : > { %v1810_v35 = vadd.f32 %v3244_v5, %v1493_v29  ;;  %v1497_v36 = vadd.f32 %v1496_v34, %v1303_v33  ;;  %v1498_v38 = vpop.f32.mrb[35].mxu0 }
 0x1d2   : > { %v1811_v39 = vadd.f32 %v3246_v8, %v1495_v32  ;;  %v1499_v40 = vadd.f32 %v1498_v38, %v1305_v37 }
 0x1d3   : > { %v1812_v41 = vadd.f32 %v3244_v5, %v1497_v36 }
 0x1d4   : > { %v2409_v42 = vpack.c.bf16 %v1811_v39, %v1810_v35  ;;  %v1813_v43 = vadd.f32 %v3246_v8, %v1499_v40 }
 0x1d5   : > { %v1309_v45 = vpop.f32.mrb[36].mxu1 }
 0x1d6   : > { %2050 = vst [vmem:[%s3253_s8 + $0x80] sm:$0xff] %v2409_v42  ;;  %v2410_v44 = vpack.c.bf16 %v1813_v43, %v1812_v41  ;;  %v1502_v46 = vpop.f32.mrb[36].mxu0  ;;  %v1311_v48 = vpop.f32.mrb[37].mxu1 }
 0x1d7   : > { %v1503_v47 = vadd.f32 %v1502_v46, %v1309_v45  ;;  %v1504_v49 = vpop.f32.mrb[37].mxu0  ;;  %v1313_v51 = vpop.f32.mrb[38].mxu1 }
 0x1d8   : > { %2051 = vst [vmem:[%s3253_s8 + $0x88] sm:$0xff] %v2410_v44  ;;  %v1505_v50 = vadd.f32 %v1504_v49, %v1311_v48  ;;  %v1506_v52 = vpop.f32.mrb[38].mxu0  ;;  %v1315_v55 = vpop.f32.mrb[39].mxu1 }
 0x1d9   : > { %v1814_v53 = vadd.f32 %v3244_v5, %v1503_v47  ;;  %v1507_v54 = vadd.f32 %v1506_v52, %v1313_v51  ;;  %v1508_v56 = vpop.f32.mrb[39].mxu0 }
 0x1da   : > { %v1815_v57 = vadd.f32 %v3246_v8, %v1505_v50  ;;  %v1509_v58 = vadd.f32 %v1508_v56, %v1315_v55 }
 0x1db   : > { %v1816_v59 = vadd.f32 %v3244_v5, %v1507_v54 }
 0x1dc   : > { %v2411_v60 = vpack.c.bf16 %v1815_v57, %v1814_v53  ;;  %v1817_v61 = vadd.f32 %v3246_v8, %v1509_v58 }
 0x1dd   : > { %v1319_v63 = vpop.f32.mrb[40].mxu1 }
 0x1de   : > { %2052 = vst [vmem:[%s3253_s8 + $0x90] sm:$0xff] %v2411_v60  ;;  %v2412_v62 = vpack.c.bf16 %v1817_v61, %v1816_v59  ;;  %v1512_v0 = vpop.f32.mrb[40].mxu0  ;;  %v1321_v2 = vpop.f32.mrb[41].mxu1 }
 0x1df   : > { %v1513_v1 = vadd.f32 %v1512_v0, %v1319_v63  ;;  %v1514_v3 = vpop.f32.mrb[41].mxu0  ;;  %v1323_v6 = vpop.f32.mrb[42].mxu1 }
 0x1e0   : > { %2053 = vst [vmem:[%s3253_s8 + $0x98] sm:$0xff] %v2412_v62  ;;  %v1515_v4 = vadd.f32 %v1514_v3, %v1321_v2  ;;  %v1516_v7 = vpop.f32.mrb[42].mxu0  ;;  %v1325_v11 = vpop.f32.mrb[43].mxu1 }
 0x1e1   : > { %v1818_v9 = vadd.f32 %v3244_v5, %v1513_v1  ;;  %v1517_v10 = vadd.f32 %v1516_v7, %v1323_v6  ;;  %v1518_v12 = vpop.f32.mrb[43].mxu0 }
 0x1e2   : > { %v1819_v13 = vadd.f32 %v3246_v8, %v1515_v4  ;;  %v1519_v14 = vadd.f32 %v1518_v12, %v1325_v11 }
 0x1e3   : > { %v1820_v15 = vadd.f32 %v3244_v5, %v1517_v10 }
 0x1e4   : > { %v2413_v16 = vpack.c.bf16 %v1819_v13, %v1818_v9  ;;  %v1821_v17 = vadd.f32 %v3246_v8, %v1519_v14 }
 0x1e5   : > { %v1329_v19 = vpop.f32.mrb[44].mxu1 }
 0x1e6   : > { %2054 = vst [vmem:[%s3253_s8 + $0xa0] sm:$0xff] %v2413_v16  ;;  %v2414_v18 = vpack.c.bf16 %v1821_v17, %v1820_v15  ;;  %v1522_v20 = vpop.f32.mrb[44].mxu0  ;;  %v1331_v22 = vpop.f32.mrb[45].mxu1 }
 0x1e7   : > { %v1523_v21 = vadd.f32 %v1522_v20, %v1329_v19  ;;  %v1524_v23 = vpop.f32.mrb[45].mxu0  ;;  %v1333_v25 = vpop.f32.mrb[46].mxu1 }
 0x1e8   : > { %2055 = vst [vmem:[%s3253_s8 + $0xa8] sm:$0xff] %v2414_v18  ;;  %v1525_v24 = vadd.f32 %v1524_v23, %v1331_v22  ;;  %v1526_v26 = vpop.f32.mrb[46].mxu0  ;;  %v1335_v29 = vpop.f32.mrb[47].mxu1 }
 0x1e9   : > { %v1822_v27 = vadd.f32 %v3244_v5, %v1523_v21  ;;  %v1527_v28 = vadd.f32 %v1526_v26, %v1333_v25  ;;  %v1528_v30 = vpop.f32.mrb[47].mxu0 }
 0x1ea   : > { %v1823_v31 = vadd.f32 %v3246_v8, %v1525_v24  ;;  %v1529_v32 = vadd.f32 %v1528_v30, %v1335_v29 }
 0x1eb   : > { %v1824_v33 = vadd.f32 %v3244_v5, %v1527_v28 }
 0x1ec   : > { %v2415_v34 = vpack.c.bf16 %v1823_v31, %v1822_v27  ;;  %v1825_v35 = vadd.f32 %v3246_v8, %v1529_v32 }
 0x1ed   : > { %v1339_v37 = vpop.f32.mrb[48].mxu1 }
 0x1ee   : > { %2056 = vst [vmem:[%s3253_s8 + $0xb0] sm:$0xff] %v2415_v34  ;;  %v2416_v36 = vpack.c.bf16 %v1825_v35, %v1824_v33  ;;  %v1532_v38 = vpop.f32.mrb[48].mxu0  ;;  %v1341_v40 = vpop.f32.mrb[49].mxu1 }
 0x1ef   : > { %v1533_v39 = vadd.f32 %v1532_v38, %v1339_v37  ;;  %v1534_v41 = vpop.f32.mrb[49].mxu0  ;;  %v1343_v43 = vpop.f32.mrb[50].mxu1 }
 0x1f0   : > { %2057 = vst [vmem:[%s3253_s8 + $0xb8] sm:$0xff] %v2416_v36  ;;  %v1535_v42 = vadd.f32 %v1534_v41, %v1341_v40  ;;  %v1536_v44 = vpop.f32.mrb[50].mxu0  ;;  %v1345_v47 = vpop.f32.mrb[51].mxu1 }
 0x1f1   : > { %v1826_v45 = vadd.f32 %v3244_v5, %v1533_v39  ;;  %v1537_v46 = vadd.f32 %v1536_v44, %v1343_v43  ;;  %v1538_v48 = vpop.f32.mrb[51].mxu0 }
 0x1f2   : > { %v1827_v49 = vadd.f32 %v3246_v8, %v1535_v42  ;;  %v1539_v50 = vadd.f32 %v1538_v48, %v1345_v47 }
 0x1f3   : > { %v1828_v51 = vadd.f32 %v3244_v5, %v1537_v46 }
 0x1f4   : > { %v2417_v52 = vpack.c.bf16 %v1827_v49, %v1826_v45  ;;  %v1829_v53 = vadd.f32 %v3246_v8, %v1539_v50 }
 0x1f5   : > { %v1349_v55 = vpop.f32.mrb[52].mxu1 }
 0x1f6   : > { %2058 = vst [vmem:[%s3253_s8 + $0xc0] sm:$0xff] %v2417_v52  ;;  %v2418_v54 = vpack.c.bf16 %v1829_v53, %v1828_v51  ;;  %v1542_v56 = vpop.f32.mrb[52].mxu0  ;;  %v1351_v58 = vpop.f32.mrb[53].mxu1 }
 0x1f7   : > { %v1543_v57 = vadd.f32 %v1542_v56, %v1349_v55  ;;  %v1544_v59 = vpop.f32.mrb[53].mxu0  ;;  %v1353_v61 = vpop.f32.mrb[54].mxu1 }
 0x1f8   : > { %2059 = vst [vmem:[%s3253_s8 + $0xc8] sm:$0xff] %v2418_v54  ;;  %v1545_v60 = vadd.f32 %v1544_v59, %v1351_v58  ;;  %v1546_v62 = vpop.f32.mrb[54].mxu0  ;;  %v1355_v1 = vpop.f32.mrb[55].mxu1 }
 0x1f9   : > { %v1830_v63 = vadd.f32 %v3244_v5, %v1543_v57  ;;  %v1547_v0 = vadd.f32 %v1546_v62, %v1353_v61  ;;  %v1548_v2 = vpop.f32.mrb[55].mxu0 }
 0x1fa   : > { %v1831_v3 = vadd.f32 %v3246_v8, %v1545_v60  ;;  %v1549_v4 = vadd.f32 %v1548_v2, %v1355_v1 }
 0x1fb   : > { %v1832_v6 = vadd.f32 %v3244_v5, %v1547_v0 }
 0x1fc   : > { %v2419_v7 = vpack.c.bf16 %v1831_v3, %v1830_v63  ;;  %v1833_v9 = vadd.f32 %v3246_v8, %v1549_v4 }
 0x1fd   : > { %v1359_v11 = vpop.f32.mrb[56].mxu1 }
 0x1fe   : > { %2060 = vst [vmem:[%s3253_s8 + $0xd0] sm:$0xff] %v2419_v7  ;;  %v2420_v10 = vpack.c.bf16 %v1833_v9, %v1832_v6  ;;  %v1552_v12 = vpop.f32.mrb[56].mxu0  ;;  %v1361_v14 = vpop.f32.mrb[57].mxu1 }
 0x1ff   : > { %v1553_v13 = vadd.f32 %v1552_v12, %v1359_v11  ;;  %v1554_v15 = vpop.f32.mrb[57].mxu0  ;;  %v1363_v17 = vpop.f32.mrb[58].mxu1 }
 0x200   : > { %2061 = vst [vmem:[%s3253_s8 + $0xd8] sm:$0xff] %v2420_v10  ;;  %v1555_v16 = vadd.f32 %v1554_v15, %v1361_v14  ;;  %v1556_v18 = vpop.f32.mrb[58].mxu0  ;;  %v1365_v21 = vpop.f32.mrb[59].mxu1 }
 0x201   : > { %v1834_v19 = vadd.f32 %v3244_v5, %v1553_v13  ;;  %v1557_v20 = vadd.f32 %v1556_v18, %v1363_v17  ;;  %v1558_v22 = vpop.f32.mrb[59].mxu0 }
 0x202   : > { %v1835_v23 = vadd.f32 %v3246_v8, %v1555_v16  ;;  %v1559_v24 = vadd.f32 %v1558_v22, %v1365_v21 }
 0x203   : > { %v1836_v25 = vadd.f32 %v3244_v5, %v1557_v20 }
 0x204   : > { %v2421_v26 = vpack.c.bf16 %v1835_v23, %v1834_v19  ;;  %v1837_v27 = vadd.f32 %v3246_v8, %v1559_v24 }
 0x205   : > { %v1369_v29 = vpop.f32.mrb[60].mxu1 }
 0x206   : > { %2062 = vst [vmem:[%s3253_s8 + $0xe0] sm:$0xff] %v2421_v26  ;;  %v2422_v28 = vpack.c.bf16 %v1837_v27, %v1836_v25  ;;  %v1562_v30 = vpop.f32.mrb[60].mxu0  ;;  %v1371_v32 = vpop.f32.mrb[61].mxu1 }
 0x207   : > { %v1563_v31 = vadd.f32 %v1562_v30, %v1369_v29  ;;  %v1564_v33 = vpop.f32.mrb[61].mxu0  ;;  %v1373_v35 = vpop.f32.mrb[62].mxu1 }
 0x208   : > { %2063 = vst [vmem:[%s3253_s8 + $0xe8] sm:$0xff] %v2422_v28  ;;  %v1565_v34 = vadd.f32 %v1564_v33, %v1371_v32  ;;  %v1566_v36 = vpop.f32.mrb[62].mxu0  ;;  %v1375_v39 = vpop.f32.mrb[63].mxu1 }
 0x209   : > { %v1838_v37 = vadd.f32 %v3244_v5, %v1563_v31  ;;  %v1567_v38 = vadd.f32 %v1566_v36, %v1373_v35  ;;  %v1568_v40 = vpop.f32.mrb[63].mxu0 }
 0x20a   : > { %v1839_v41 = vadd.f32 %v3246_v8, %v1565_v34  ;;  %v1569_v42 = vadd.f32 %v1568_v40, %v1375_v39 }
 0x20b   : > { %v1840_v43 = vadd.f32 %v3244_v5, %v1567_v38 }
 0x20c   : > { %v2423_v44 = vpack.c.bf16 %v1839_v41, %v1838_v37  ;;  %v1841_v45 = vadd.f32 %v3246_v8, %v1569_v42 }
 0x20e   : > { %2064 = vst [vmem:[%s3253_s8 + $0xf0] sm:$0xff] %v2423_v44  ;;  %v2424_v46 = vpack.c.bf16 %v1841_v45, %v1840_v43 }
 0x210   : > { %2065 = vst [vmem:[%s3253_s8 + $0xf8] sm:$0xff] %v2424_v46 }
 0x211   : > { %2869 = shalt.err (!%p2866_p7)
}
 0x212   : > { %s2870_s18 = scalar_lea.hbm %s3350_s23, 4096  ;;  %s2874_s6 = scalar_lea.hbm %s3405_s3, 24576 }
 0x213   : > { %p2871_p9 = scmp.ne.s32.totalorder %s3350_s23, %s2870_s18  ;;  %p2875_p10 = scmp.lt.u32.totalorder %s3350_s23, %s3405_s3 }
 0x214   : > { %p2876_p2 = scmp.lt.u32.totalorder %s2874_s6, %s2870_s18  ;;  %p2878_p3 = scmp.lt.u32.totalorder %s2870_s18, %s3350_s23 }
 0x215   : > { %p2872_p12 = pnand %p2871_p9, %p3430_p5 }
 0x216   : > { %p2877_p0 = por %p2876_p2, %p2875_p10 }
 0x217   : > { %p2873_p6 = pneg %p2872_p12 }
 0x218   : > { %p2879_p1 = por %p2878_p3, %p2877_p0 }
 0x21a   : > { %p2880_p11 = pnand %p2879_p1, %p2873_p6 }
 0x21c   : > { %2883 = shalt.err (!%p2880_p11)
}
 0x21d   : > { %s2953_s30 = smov 128   ;;  %s2954_s7 = smov 768  }
 0x21e   : > { %s2955_s8 = smov 8  }
 0x21f   : > { %2498 = dma.vmem_to_hbm [thread:$0]  (%p3430_p5), %s3352_s27, 4096, %s3350_s23, %s2067_s15, %s2953_s30, %s2954_s7, %s2955_s8  }
 0x220 PF: > { %p2518_p13 = scmp.ge.s32.totalorder %s2942_s17, 2  ;;  %s2098_s25 = sand.u32 1, %s2922_s12  }
 0x221   : > { %p3431_p8 = scmp.ne.s32.totalorder %s3420_s4, 0  ;;  %s2099_s22 = scalar_lea.sflag [#allocation5], %s2098_s25 }
 0x223   : > { %p2512_p4 = pnand %p2518_p13, %p3431_p8 }
 0x225   : > { %2917 = dma.done.wait (!%p2512_p4), %s2099_s22, 4096  }
 0x226   : > { %2919 = vsyncadd (!%p2512_p4), %s2099_s22, 4294963200  ;;  %s20_s17 = sadd.s32 1, %s2942_s17   ;;  %s3432_s28 = sld [smem:[#allocation13_spill]] }
 0x227   : > { %p17_p7 = scmp.ge.s32.totalorder %s20_s17, 8   ;;  %s3433_s12 = smov %s2926_s13 }
 0x228   : > { %s3434_s13 = smov %s2930_s14  ;;  %s3435_s14 = smov %s3023_s24 }
 0x229   : > { %s3436_s15 = smov %s2938_s16  ;;  %19 = sbr.rel (!%p17_p7) target bundleno = 9 (0x9), region = 102 }
 0x22c   : > { %s3437_s16 = smov %s3432_s28 }
 0x230   :  { %2104 = vsyncpa [#allocation4], 1 }
 0x231   :  { %2106 = vsyncpa [#allocation4 + $0x1], 1 }
 0x232   :  { %2107 = vsyncpa [#allocation7], 1 }
 0x233   :  { %2109 = vsyncpa [#allocation7 + $0x1], 1 }
 0x234   :  { %2110 = vsyncpa [#allocation5], 1 }
 0x235   :  { %2112 = vsyncpa [#allocation5 + $0x1], 1 }

</bundles_post_ra>
